<compile_context>
chip_gen: v5e
topology: v5e:2x2
jax: 0.10.0
libtpu: 0.0.40
codegen_flags: <defaults>
</compile_context>

<pallas_src>
import functools

import jax
import jax.numpy as jnp
from jax import lax
from jax.experimental import pallas as pl
from jax.experimental.pallas import tpu as pltpu

HIDDEN_SIZE = 4
RNN_LAYERS = 1
TIMESTEPS_PREDICT = 4


def _rnn_decoder_kernel(x_ref, h0_ref, w0_ref, wc_ref, bias_ref, y_ref, *,
                        seq_len, n_predict, hidden_size):
    # x_ref    : (TB, S)    input sequence block (feature dim of size 1 squeezed)
    # h0_ref   : (TB, H)    initial hidden state block (layer dim squeezed)
    # w0_ref   : (1, H)     fc0.weight (torch (H, 1)) transposed
    # wc_ref   : (H, H+1)   [fc.weight^T | decoder.weight^T] fused recurrent+decode weight
    # bias_ref : (1, H+1)   [fc0.bias + fc.bias | decoder.bias]
    # y_ref    : (TB, S + n_predict) decoded outputs
    H = hidden_size
    TB = x_ref.shape[0]

    # Hoisted broadcasts: done once, NOT re-emitted inside the unrolled recurrence.
    w0 = jnp.broadcast_to(w0_ref[...], (TB, H))
    bias = jnp.broadcast_to(bias_ref[...], (TB, H + 1))
    wrows = [jnp.broadcast_to(wc_ref[k:k + 1, :], (TB, H + 1)) for k in range(H)]

    def fused_product(h):
        # z = h @ [W^T | Wd^T] + [b0+b | bd], as H broadcast multiply-adds on the
        # VPU (exact f32; avoids MXU push/pop latency on the serial chain).
        z = bias + h[:, 0:1] * wrows[0]
        for k in range(1, H):
            z = z + h[:, k:k + 1] * wrows[k]
        return z                                      # (TB, H+1)

    z = fused_product(h0_ref[...])                    # rec (+bias) for step 0; decode col unused
    last = None

    # Encoder: statically unrolled recurrence over the input sequence.
    for t in range(seq_len):
        h = jnp.tanh(x_ref[:, t:t + 1] * w0 + z[:, :H])   # tanh(fc0(x_t) + fc(h_{t-1}))
        z = fused_product(h)
        last = z[:, H:H + 1]                               # decoder(h_t)
        y_ref[:, t:t + 1] = last                           # per-step store (no concat epilogue)

    # Training-mode autoregressive rollout: feed the decoded output back in.
    for p in range(n_predict):
        h = jnp.tanh(last * w0 + z[:, :H])
        z = fused_product(h)
        last = z[:, H:H + 1]
        y_ref[:, seq_len + p:seq_len + p + 1] = last


def model_forward(x, hidden, params, training=True):
    """Pallas equivalent of ModelPytorch.forward (training mode includes the rollout)."""
    B, S, _ = x.shape
    H = HIDDEN_SIZE
    n_pred = TIMESTEPS_PREDICT if training else 0
    T = S + n_pred
    w0, b0, w, b, wd, bd = params

    # One-time weight/bias packing in the wrapper (outside the serial recurrence):
    #   wc   = [W^T | Wd^T]    (H, H+1)    -> fused recurrent + decode product
    #   bias = [b0 + b | bd]   (1, H+1)
    wc = jnp.concatenate([w.T, wd.T], axis=1).astype(jnp.float32)
    bias = jnp.concatenate([(b0 + b).reshape(1, H), bd.reshape(1, 1)],
                           axis=1).astype(jnp.float32)
    w0row = w0.T.reshape(1, H).astype(jnp.float32)

    x2d = x[:, :, 0].astype(jnp.float32)              # (B, S)
    h0 = hidden[0].astype(jnp.float32)                # (B, H)

    # Batch tiling: a single block for small B; 8-aligned tiles for large B so
    # the grid shards across TensorCores (v7x) and tiles stay well inside VMEM.
    TB = B
    if B > 512:
        for cand in (512, 256, 128, 64, 32, 16, 8):
            if B % cand == 0:
                TB = cand
                break

    kern = functools.partial(_rnn_decoder_kernel, seq_len=S, n_predict=n_pred,
                             hidden_size=H)

    y2d = pl.pallas_call(
        kern,
        out_shape=jax.ShapeDtypeStruct((B, T), jnp.float32),
        grid=(B // TB,),
        in_specs=[
            pl.BlockSpec((TB, S), lambda i: (i, 0)),
            pl.BlockSpec((TB, H), lambda i: (i, 0)),
            pl.BlockSpec((1, H), lambda i: (0, 0)),
            pl.BlockSpec((H, H + 1), lambda i: (0, 0)),
            pl.BlockSpec((1, H + 1), lambda i: (0, 0)),
        ],
        out_specs=pl.BlockSpec((TB, T), lambda i: (i, 0)),
        compiler_params=pltpu.CompilerParams(
            dimension_semantics=("parallel",)),
    )(x2d, h0, w0row, wc, bias)
    return y2d[:, :, None]                            # (B, S + P, 1), matching the torch module


def reference_forward(x, hidden, params, training=True):
    """Pure-JAX reference mirroring the PyTorch graph exactly (full f32 precision)."""
    w0, b0, w, b, wd, bd = params
    h = hidden[0]
    pr = lax.Precision.HIGHEST

    def cell(inp, h):
        return jnp.tanh(jnp.dot(inp, w0.T, precision=pr) + b0 +
                        jnp.dot(h, w.T, precision=pr) + b)

    def decode(h):
        return jnp.dot(h, wd.T, precision=pr) + bd

    ys = []
    for t in range(x.shape[1]):
        h = cell(x[:, t, :], h)
        ys.append(decode(h))
    if training:
        last = ys[-1]
        for _ in range(TIMESTEPS_PREDICT):
            h = cell(last, h)
            last = decode(h)
            ys.append(last)
    return jnp.stack(ys, axis=1)                      # (B, S + P, 1)


if __name__ == "__main__":
    B, S, H = 32, 8, HIDDEN_SIZE   # BATCH_SIZE=32 in the torch module

    key = jax.random.PRNGKey(0)
    keys = jax.random.split(key, 7)

    def uinit(k, shape, fan_in):
        bound = 1.0 / jnp.sqrt(jnp.float32(fan_in))
        return jax.random.uniform(k, shape, jnp.float32, -bound, bound)

    # Deterministic parameter init (torch Linear-style uniform bounds).
    w0 = uinit(keys[0], (H, 1), 1)    # fc0.weight
    b0 = uinit(keys[1], (H,), 1)      # fc0.bias
    w = uinit(keys[2], (H, H), H)     # fc.weight
    b = uinit(keys[3], (H,), H)       # fc.bias
    wd = uinit(keys[4], (1, H), H)    # decoder Linear weight
    bd = uinit(keys[5], (1,), H)      # decoder Linear bias
    params = (w0, b0, w, b, wd, bd)

    x = jax.random.normal(keys[6], (B, S, 1), jnp.float32)
    hidden = jnp.zeros((RNN_LAYERS, B, H), jnp.float32)   # reset_hidden(BATCH_SIZE)

    y = model_forward(x, hidden, params, training=True)   # nn.Module defaults to training mode
    y = jax.block_until_ready(y)

    y_ref = reference_forward(x, hidden, params, training=True)
    assert y.shape == (B, S + TIMESTEPS_PREDICT, 1), y.shape
    assert jnp.allclose(y, y_ref, atol=1e-4, rtol=1e-4), float(jnp.max(jnp.abs(y - y_ref)))

    print("KERNEL_OK")
</pallas_src>

<mosaic_0001>
module attributes {stable_mosaic.version = 11 : i64} {
  func.func @_rnn_decoder_kernel(%arg0: i32, %arg1: memref<32x8xf32, #tpu.memory_space<vmem>>, %arg2: memref<32x4xf32, #tpu.memory_space<vmem>>, %arg3: memref<1x4xf32, #tpu.memory_space<vmem>>, %arg4: memref<4x5xf32, #tpu.memory_space<vmem>>, %arg5: memref<1x5xf32, #tpu.memory_space<vmem>>, %arg6: memref<32x12xf32, #tpu.memory_space<vmem>>) attributes {dimension_semantics = [#tpu.dimension_semantics<parallel>], iteration_bounds = array<i64: 1>, scalar_prefetch = 0 : i64, scratch_operands = 0 : i64, tpu.core_type = #tpu.core_type<tc>, window_params = [{transform_indices = @transform_0, window_bounds = array<i64: 32, 8>}, {transform_indices = @transform_1, window_bounds = array<i64: 32, 4>}, {pipeline_mode = #tpu.pipeline_mode<synchronous>, transform_indices = @transform_2, window_bounds = array<i64: 1, 4>}, {pipeline_mode = #tpu.pipeline_mode<synchronous>, transform_indices = @transform_3, window_bounds = array<i64: 4, 5>}, {pipeline_mode = #tpu.pipeline_mode<synchronous>, transform_indices = @transform_4, window_bounds = array<i64: 1, 5>}, {transform_indices = @transform_5, window_bounds = array<i64: 32, 12>}]} {
    %c0 = arith.constant 0 : index
    %c0_0 = arith.constant 0 : index
    %0 = vector.load %arg3[%c0, %c0_0] : memref<1x4xf32, #tpu.memory_space<vmem>>, vector<1x4xf32>
    %1 = vector.shape_cast %0 : vector<1x4xf32> to vector<1x4xf32>
    %2 = vector.broadcast %1 : vector<1x4xf32> to vector<32x4xf32>
    %c0_1 = arith.constant 0 : index
    %c0_2 = arith.constant 0 : index
    %3 = vector.load %arg5[%c0_1, %c0_2] : memref<1x5xf32, #tpu.memory_space<vmem>>, vector<1x5xf32>
    %4 = vector.shape_cast %3 : vector<1x5xf32> to vector<1x5xf32>
    %5 = vector.broadcast %4 : vector<1x5xf32> to vector<32x5xf32>
    %c0_3 = arith.constant 0 : index
    %c0_4 = arith.constant 0 : index
    %6 = vector.load %arg4[%c0_3, %c0_4] : memref<4x5xf32, #tpu.memory_space<vmem>>, vector<1x5xf32>
    %7 = vector.shape_cast %6 : vector<1x5xf32> to vector<1x5xf32>
    %8 = vector.broadcast %7 : vector<1x5xf32> to vector<32x5xf32>
    %c1 = arith.constant 1 : index
    %c0_5 = arith.constant 0 : index
    %9 = vector.load %arg4[%c1, %c0_5] : memref<4x5xf32, #tpu.memory_space<vmem>>, vector<1x5xf32>
    %10 = vector.shape_cast %9 : vector<1x5xf32> to vector<1x5xf32>
    %11 = vector.broadcast %10 : vector<1x5xf32> to vector<32x5xf32>
    %c2 = arith.constant 2 : index
    %c0_6 = arith.constant 0 : index
    %12 = vector.load %arg4[%c2, %c0_6] : memref<4x5xf32, #tpu.memory_space<vmem>>, vector<1x5xf32>
    %13 = vector.shape_cast %12 : vector<1x5xf32> to vector<1x5xf32>
    %14 = vector.broadcast %13 : vector<1x5xf32> to vector<32x5xf32>
    %c3 = arith.constant 3 : index
    %c0_7 = arith.constant 0 : index
    %15 = vector.load %arg4[%c3, %c0_7] : memref<4x5xf32, #tpu.memory_space<vmem>>, vector<1x5xf32>
    %16 = vector.shape_cast %15 : vector<1x5xf32> to vector<1x5xf32>
    %17 = vector.broadcast %16 : vector<1x5xf32> to vector<32x5xf32>
    %c0_8 = arith.constant 0 : index
    %c0_9 = arith.constant 0 : index
    %18 = vector.load %arg2[%c0_8, %c0_9] : memref<32x4xf32, #tpu.memory_space<vmem>>, vector<32x4xf32>
    %19 = vector.extract_strided_slice %18 {offsets = [0, 0], sizes = [32, 1], strides = [1, 1]} : vector<32x4xf32> to vector<32x1xf32>
    %20 = vector.broadcast %19 : vector<32x1xf32> to vector<32x5xf32>
    %21 = arith.mulf %20, %8 : vector<32x5xf32>
    %22 = arith.addf %5, %21 : vector<32x5xf32>
    %23 = vector.extract_strided_slice %18 {offsets = [0, 1], sizes = [32, 1], strides = [1, 1]} : vector<32x4xf32> to vector<32x1xf32>
    %24 = vector.broadcast %23 : vector<32x1xf32> to vector<32x5xf32>
    %25 = arith.mulf %24, %11 : vector<32x5xf32>
    %26 = arith.addf %22, %25 : vector<32x5xf32>
    %27 = vector.extract_strided_slice %18 {offsets = [0, 2], sizes = [32, 1], strides = [1, 1]} : vector<32x4xf32> to vector<32x1xf32>
    %28 = vector.broadcast %27 : vector<32x1xf32> to vector<32x5xf32>
    %29 = arith.mulf %28, %14 : vector<32x5xf32>
    %30 = arith.addf %26, %29 : vector<32x5xf32>
    %31 = vector.extract_strided_slice %18 {offsets = [0, 3], sizes = [32, 1], strides = [1, 1]} : vector<32x4xf32> to vector<32x1xf32>
    %32 = vector.broadcast %31 : vector<32x1xf32> to vector<32x5xf32>
    %33 = arith.mulf %32, %17 : vector<32x5xf32>
    %34 = arith.addf %30, %33 : vector<32x5xf32>
    %c0_10 = arith.constant 0 : index
    %c0_11 = arith.constant 0 : index
    %35 = vector.load %arg1[%c0_10, %c0_11] : memref<32x8xf32, #tpu.memory_space<vmem>>, vector<32x1xf32>
    %36 = vector.broadcast %35 : vector<32x1xf32> to vector<32x4xf32>
    %37 = arith.mulf %36, %2 : vector<32x4xf32>
    %38 = vector.extract_strided_slice %34 {offsets = [0, 0], sizes = [32, 4], strides = [1, 1]} : vector<32x5xf32> to vector<32x4xf32>
    %39 = arith.addf %37, %38 : vector<32x4xf32>
    %40 = math.tanh %39 : vector<32x4xf32>
    %41 = vector.extract_strided_slice %40 {offsets = [0, 0], sizes = [32, 1], strides = [1, 1]} : vector<32x4xf32> to vector<32x1xf32>
    %42 = vector.broadcast %41 : vector<32x1xf32> to vector<32x5xf32>
    %43 = arith.mulf %42, %8 : vector<32x5xf32>
    %44 = arith.addf %5, %43 : vector<32x5xf32>
    %45 = vector.extract_strided_slice %40 {offsets = [0, 1], sizes = [32, 1], strides = [1, 1]} : vector<32x4xf32> to vector<32x1xf32>
    %46 = vector.broadcast %45 : vector<32x1xf32> to vector<32x5xf32>
    %47 = arith.mulf %46, %11 : vector<32x5xf32>
    %48 = arith.addf %44, %47 : vector<32x5xf32>
    %49 = vector.extract_strided_slice %40 {offsets = [0, 2], sizes = [32, 1], strides = [1, 1]} : vector<32x4xf32> to vector<32x1xf32>
    %50 = vector.broadcast %49 : vector<32x1xf32> to vector<32x5xf32>
    %51 = arith.mulf %50, %14 : vector<32x5xf32>
    %52 = arith.addf %48, %51 : vector<32x5xf32>
    %53 = vector.extract_strided_slice %40 {offsets = [0, 3], sizes = [32, 1], strides = [1, 1]} : vector<32x4xf32> to vector<32x1xf32>
    %54 = vector.broadcast %53 : vector<32x1xf32> to vector<32x5xf32>
    %55 = arith.mulf %54, %17 : vector<32x5xf32>
    %56 = arith.addf %52, %55 : vector<32x5xf32>
    %57 = vector.extract_strided_slice %56 {offsets = [0, 4], sizes = [32, 1], strides = [1, 1]} : vector<32x5xf32> to vector<32x1xf32>
    %c0_12 = arith.constant 0 : index
    %c0_13 = arith.constant 0 : index
    %58 = vector.load %arg6[%c0_12, %c0_13] : memref<32x12xf32, #tpu.memory_space<vmem>>, vector<32x1xf32>
    tpu.vector_store %arg6[%c0_12, %c0_13], %57 {strides = array<i32>} : memref<32x12xf32, #tpu.memory_space<vmem>>, vector<32x1xf32>,
    %c0_14 = arith.constant 0 : index
    %c1_15 = arith.constant 1 : index
    %59 = vector.load %arg1[%c0_14, %c1_15] : memref<32x8xf32, #tpu.memory_space<vmem>>, vector<32x1xf32>
    %60 = vector.broadcast %59 : vector<32x1xf32> to vector<32x4xf32>
    %61 = arith.mulf %60, %2 : vector<32x4xf32>
    %62 = vector.extract_strided_slice %56 {offsets = [0, 0], sizes = [32, 4], strides = [1, 1]} : vector<32x5xf32> to vector<32x4xf32>
    %63 = arith.addf %61, %62 : vector<32x4xf32>
    %64 = math.tanh %63 : vector<32x4xf32>
    %65 = vector.extract_strided_slice %64 {offsets = [0, 0], sizes = [32, 1], strides = [1, 1]} : vector<32x4xf32> to vector<32x1xf32>
    %66 = vector.broadcast %65 : vector<32x1xf32> to vector<32x5xf32>
    %67 = arith.mulf %66, %8 : vector<32x5xf32>
    %68 = arith.addf %5, %67 : vector<32x5xf32>
    %69 = vector.extract_strided_slice %64 {offsets = [0, 1], sizes = [32, 1], strides = [1, 1]} : vector<32x4xf32> to vector<32x1xf32>
    %70 = vector.broadcast %69 : vector<32x1xf32> to vector<32x5xf32>
    %71 = arith.mulf %70, %11 : vector<32x5xf32>
    %72 = arith.addf %68, %71 : vector<32x5xf32>
    %73 = vector.extract_strided_slice %64 {offsets = [0, 2], sizes = [32, 1], strides = [1, 1]} : vector<32x4xf32> to vector<32x1xf32>
    %74 = vector.broadcast %73 : vector<32x1xf32> to vector<32x5xf32>
    %75 = arith.mulf %74, %14 : vector<32x5xf32>
    %76 = arith.addf %72, %75 : vector<32x5xf32>
    %77 = vector.extract_strided_slice %64 {offsets = [0, 3], sizes = [32, 1], strides = [1, 1]} : vector<32x4xf32> to vector<32x1xf32>
    %78 = vector.broadcast %77 : vector<32x1xf32> to vector<32x5xf32>
    %79 = arith.mulf %78, %17 : vector<32x5xf32>
    %80 = arith.addf %76, %79 : vector<32x5xf32>
    %81 = vector.extract_strided_slice %80 {offsets = [0, 4], sizes = [32, 1], strides = [1, 1]} : vector<32x5xf32> to vector<32x1xf32>
    %c0_16 = arith.constant 0 : index
    %c1_17 = arith.constant 1 : index
    %82 = vector.load %arg6[%c0_16, %c1_17] : memref<32x12xf32, #tpu.memory_space<vmem>>, vector<32x1xf32>
    tpu.vector_store %arg6[%c0_16, %c1_17], %81 {strides = array<i32>} : memref<32x12xf32, #tpu.memory_space<vmem>>, vector<32x1xf32>,
    %c0_18 = arith.constant 0 : index
    %c2_19 = arith.constant 2 : index
    %83 = vector.load %arg1[%c0_18, %c2_19] : memref<32x8xf32, #tpu.memory_space<vmem>>, vector<32x1xf32>
    %84 = vector.broadcast %83 : vector<32x1xf32> to vector<32x4xf32>
    %85 = arith.mulf %84, %2 : vector<32x4xf32>
    %86 = vector.extract_strided_slice %80 {offsets = [0, 0], sizes = [32, 4], strides = [1, 1]} : vector<32x5xf32> to vector<32x4xf32>
    %87 = arith.addf %85, %86 : vector<32x4xf32>
    %88 = math.tanh %87 : vector<32x4xf32>
    %89 = vector.extract_strided_slice %88 {offsets = [0, 0], sizes = [32, 1], strides = [1, 1]} : vector<32x4xf32> to vector<32x1xf32>
    %90 = vector.broadcast %89 : vector<32x1xf32> to vector<32x5xf32>
    %91 = arith.mulf %90, %8 : vector<32x5xf32>
    %92 = arith.addf %5, %91 : vector<32x5xf32>
    %93 = vector.extract_strided_slice %88 {offsets = [0, 1], sizes = [32, 1], strides = [1, 1]} : vector<32x4xf32> to vector<32x1xf32>
    %94 = vector.broadcast %93 : vector<32x1xf32> to vector<32x5xf32>
    %95 = arith.mulf %94, %11 : vector<32x5xf32>
    %96 = arith.addf %92, %95 : vector<32x5xf32>
    %97 = vector.extract_strided_slice %88 {offsets = [0, 2], sizes = [32, 1], strides = [1, 1]} : vector<32x4xf32> to vector<32x1xf32>
    %98 = vector.broadcast %97 : vector<32x1xf32> to vector<32x5xf32>
    %99 = arith.mulf %98, %14 : vector<32x5xf32>
    %100 = arith.addf %96, %99 : vector<32x5xf32>
    %101 = vector.extract_strided_slice %88 {offsets = [0, 3], sizes = [32, 1], strides = [1, 1]} : vector<32x4xf32> to vector<32x1xf32>
    %102 = vector.broadcast %101 : vector<32x1xf32> to vector<32x5xf32>
    %103 = arith.mulf %102, %17 : vector<32x5xf32>
    %104 = arith.addf %100, %103 : vector<32x5xf32>
    %105 = vector.extract_strided_slice %104 {offsets = [0, 4], sizes = [32, 1], strides = [1, 1]} : vector<32x5xf32> to vector<32x1xf32>
    %c0_20 = arith.constant 0 : index
    %c2_21 = arith.constant 2 : index
    %106 = vector.load %arg6[%c0_20, %c2_21] : memref<32x12xf32, #tpu.memory_space<vmem>>, vector<32x1xf32>
    tpu.vector_store %arg6[%c0_20, %c2_21], %105 {strides = array<i32>} : memref<32x12xf32, #tpu.memory_space<vmem>>, vector<32x1xf32>,
    %c0_22 = arith.constant 0 : index
    %c3_23 = arith.constant 3 : index
    %107 = vector.load %arg1[%c0_22, %c3_23] : memref<32x8xf32, #tpu.memory_space<vmem>>, vector<32x1xf32>
    %108 = vector.broadcast %107 : vector<32x1xf32> to vector<32x4xf32>
    %109 = arith.mulf %108, %2 : vector<32x4xf32>
    %110 = vector.extract_strided_slice %104 {offsets = [0, 0], sizes = [32, 4], strides = [1, 1]} : vector<32x5xf32> to vector<32x4xf32>
    %111 = arith.addf %109, %110 : vector<32x4xf32>
    %112 = math.tanh %111 : vector<32x4xf32>
    %113 = vector.extract_strided_slice %112 {offsets = [0, 0], sizes = [32, 1], strides = [1, 1]} : vector<32x4xf32> to vector<32x1xf32>
    %114 = vector.broadcast %113 : vector<32x1xf32> to vector<32x5xf32>
    %115 = arith.mulf %114, %8 : vector<32x5xf32>
    %116 = arith.addf %5, %115 : vector<32x5xf32>
    %117 = vector.extract_strided_slice %112 {offsets = [0, 1], sizes = [32, 1], strides = [1, 1]} : vector<32x4xf32> to vector<32x1xf32>
    %118 = vector.broadcast %117 : vector<32x1xf32> to vector<32x5xf32>
    %119 = arith.mulf %118, %11 : vector<32x5xf32>
    %120 = arith.addf %116, %119 : vector<32x5xf32>
    %121 = vector.extract_strided_slice %112 {offsets = [0, 2], sizes = [32, 1], strides = [1, 1]} : vector<32x4xf32> to vector<32x1xf32>
    %122 = vector.broadcast %121 : vector<32x1xf32> to vector<32x5xf32>
    %123 = arith.mulf %122, %14 : vector<32x5xf32>
    %124 = arith.addf %120, %123 : vector<32x5xf32>
    %125 = vector.extract_strided_slice %112 {offsets = [0, 3], sizes = [32, 1], strides = [1, 1]} : vector<32x4xf32> to vector<32x1xf32>
    %126 = vector.broadcast %125 : vector<32x1xf32> to vector<32x5xf32>
    %127 = arith.mulf %126, %17 : vector<32x5xf32>
    %128 = arith.addf %124, %127 : vector<32x5xf32>
    %129 = vector.extract_strided_slice %128 {offsets = [0, 4], sizes = [32, 1], strides = [1, 1]} : vector<32x5xf32> to vector<32x1xf32>
    %c0_24 = arith.constant 0 : index
    %c3_25 = arith.constant 3 : index
    %130 = vector.load %arg6[%c0_24, %c3_25] : memref<32x12xf32, #tpu.memory_space<vmem>>, vector<32x1xf32>
    tpu.vector_store %arg6[%c0_24, %c3_25], %129 {strides = array<i32>} : memref<32x12xf32, #tpu.memory_space<vmem>>, vector<32x1xf32>,
    %c0_26 = arith.constant 0 : index
    %c4 = arith.constant 4 : index
    %131 = vector.load %arg1[%c0_26, %c4] : memref<32x8xf32, #tpu.memory_space<vmem>>, vector<32x1xf32>
    %132 = vector.broadcast %131 : vector<32x1xf32> to vector<32x4xf32>
    %133 = arith.mulf %132, %2 : vector<32x4xf32>
    %134 = vector.extract_strided_slice %128 {offsets = [0, 0], sizes = [32, 4], strides = [1, 1]} : vector<32x5xf32> to vector<32x4xf32>
    %135 = arith.addf %133, %134 : vector<32x4xf32>
    %136 = math.tanh %135 : vector<32x4xf32>
    %137 = vector.extract_strided_slice %136 {offsets = [0, 0], sizes = [32, 1], strides = [1, 1]} : vector<32x4xf32> to vector<32x1xf32>
    %138 = vector.broadcast %137 : vector<32x1xf32> to vector<32x5xf32>
    %139 = arith.mulf %138, %8 : vector<32x5xf32>
    %140 = arith.addf %5, %139 : vector<32x5xf32>
    %141 = vector.extract_strided_slice %136 {offsets = [0, 1], sizes = [32, 1], strides = [1, 1]} : vector<32x4xf32> to vector<32x1xf32>
    %142 = vector.broadcast %141 : vector<32x1xf32> to vector<32x5xf32>
    %143 = arith.mulf %142, %11 : vector<32x5xf32>
    %144 = arith.addf %140, %143 : vector<32x5xf32>
    %145 = vector.extract_strided_slice %136 {offsets = [0, 2], sizes = [32, 1], strides = [1, 1]} : vector<32x4xf32> to vector<32x1xf32>
    %146 = vector.broadcast %145 : vector<32x1xf32> to vector<32x5xf32>
    %147 = arith.mulf %146, %14 : vector<32x5xf32>
    %148 = arith.addf %144, %147 : vector<32x5xf32>
    %149 = vector.extract_strided_slice %136 {offsets = [0, 3], sizes = [32, 1], strides = [1, 1]} : vector<32x4xf32> to vector<32x1xf32>
    %150 = vector.broadcast %149 : vector<32x1xf32> to vector<32x5xf32>
    %151 = arith.mulf %150, %17 : vector<32x5xf32>
    %152 = arith.addf %148, %151 : vector<32x5xf32>
    %153 = vector.extract_strided_slice %152 {offsets = [0, 4], sizes = [32, 1], strides = [1, 1]} : vector<32x5xf32> to vector<32x1xf32>
    %c0_27 = arith.constant 0 : index
    %c4_28 = arith.constant 4 : index
    %154 = vector.load %arg6[%c0_27, %c4_28] : memref<32x12xf32, #tpu.memory_space<vmem>>, vector<32x1xf32>
    tpu.vector_store %arg6[%c0_27, %c4_28], %153 {strides = array<i32>} : memref<32x12xf32, #tpu.memory_space<vmem>>, vector<32x1xf32>,
    %c0_29 = arith.constant 0 : index
    %c5 = arith.constant 5 : index
    %155 = vector.load %arg1[%c0_29, %c5] : memref<32x8xf32, #tpu.memory_space<vmem>>, vector<32x1xf32>
    %156 = vector.broadcast %155 : vector<32x1xf32> to vector<32x4xf32>
    %157 = arith.mulf %156, %2 : vector<32x4xf32>
    %158 = vector.extract_strided_slice %152 {offsets = [0, 0], sizes = [32, 4], strides = [1, 1]} : vector<32x5xf32> to vector<32x4xf32>
    %159 = arith.addf %157, %158 : vector<32x4xf32>
    %160 = math.tanh %159 : vector<32x4xf32>
    %161 = vector.extract_strided_slice %160 {offsets = [0, 0], sizes = [32, 1], strides = [1, 1]} : vector<32x4xf32> to vector<32x1xf32>
    %162 = vector.broadcast %161 : vector<32x1xf32> to vector<32x5xf32>
    %163 = arith.mulf %162, %8 : vector<32x5xf32>
    %164 = arith.addf %5, %163 : vector<32x5xf32>
    %165 = vector.extract_strided_slice %160 {offsets = [0, 1], sizes = [32, 1], strides = [1, 1]} : vector<32x4xf32> to vector<32x1xf32>
    %166 = vector.broadcast %165 : vector<32x1xf32> to vector<32x5xf32>
    %167 = arith.mulf %166, %11 : vector<32x5xf32>
    %168 = arith.addf %164, %167 : vector<32x5xf32>
    %169 = vector.extract_strided_slice %160 {offsets = [0, 2], sizes = [32, 1], strides = [1, 1]} : vector<32x4xf32> to vector<32x1xf32>
    %170 = vector.broadcast %169 : vector<32x1xf32> to vector<32x5xf32>
    %171 = arith.mulf %170, %14 : vector<32x5xf32>
    %172 = arith.addf %168, %171 : vector<32x5xf32>
    %173 = vector.extract_strided_slice %160 {offsets = [0, 3], sizes = [32, 1], strides = [1, 1]} : vector<32x4xf32> to vector<32x1xf32>
    %174 = vector.broadcast %173 : vector<32x1xf32> to vector<32x5xf32>
    %175 = arith.mulf %174, %17 : vector<32x5xf32>
    %176 = arith.addf %172, %175 : vector<32x5xf32>
    %177 = vector.extract_strided_slice %176 {offsets = [0, 4], sizes = [32, 1], strides = [1, 1]} : vector<32x5xf32> to vector<32x1xf32>
    %c0_30 = arith.constant 0 : index
    %c5_31 = arith.constant 5 : index
    %178 = vector.load %arg6[%c0_30, %c5_31] : memref<32x12xf32, #tpu.memory_space<vmem>>, vector<32x1xf32>
    tpu.vector_store %arg6[%c0_30, %c5_31], %177 {strides = array<i32>} : memref<32x12xf32, #tpu.memory_space<vmem>>, vector<32x1xf32>,
    %c0_32 = arith.constant 0 : index
    %c6 = arith.constant 6 : index
    %179 = vector.load %arg1[%c0_32, %c6] : memref<32x8xf32, #tpu.memory_space<vmem>>, vector<32x1xf32>
    %180 = vector.broadcast %179 : vector<32x1xf32> to vector<32x4xf32>
    %181 = arith.mulf %180, %2 : vector<32x4xf32>
    %182 = vector.extract_strided_slice %176 {offsets = [0, 0], sizes = [32, 4], strides = [1, 1]} : vector<32x5xf32> to vector<32x4xf32>
    %183 = arith.addf %181, %182 : vector<32x4xf32>
    %184 = math.tanh %183 : vector<32x4xf32>
    %185 = vector.extract_strided_slice %184 {offsets = [0, 0], sizes = [32, 1], strides = [1, 1]} : vector<32x4xf32> to vector<32x1xf32>
    %186 = vector.broadcast %185 : vector<32x1xf32> to vector<32x5xf32>
    %187 = arith.mulf %186, %8 : vector<32x5xf32>
    %188 = arith.addf %5, %187 : vector<32x5xf32>
    %189 = vector.extract_strided_slice %184 {offsets = [0, 1], sizes = [32, 1], strides = [1, 1]} : vector<32x4xf32> to vector<32x1xf32>
    %190 = vector.broadcast %189 : vector<32x1xf32> to vector<32x5xf32>
    %191 = arith.mulf %190, %11 : vector<32x5xf32>
    %192 = arith.addf %188, %191 : vector<32x5xf32>
    %193 = vector.extract_strided_slice %184 {offsets = [0, 2], sizes = [32, 1], strides = [1, 1]} : vector<32x4xf32> to vector<32x1xf32>
    %194 = vector.broadcast %193 : vector<32x1xf32> to vector<32x5xf32>
    %195 = arith.mulf %194, %14 : vector<32x5xf32>
    %196 = arith.addf %192, %195 : vector<32x5xf32>
    %197 = vector.extract_strided_slice %184 {offsets = [0, 3], sizes = [32, 1], strides = [1, 1]} : vector<32x4xf32> to vector<32x1xf32>
    %198 = vector.broadcast %197 : vector<32x1xf32> to vector<32x5xf32>
    %199 = arith.mulf %198, %17 : vector<32x5xf32>
    %200 = arith.addf %196, %199 : vector<32x5xf32>
    %201 = vector.extract_strided_slice %200 {offsets = [0, 4], sizes = [32, 1], strides = [1, 1]} : vector<32x5xf32> to vector<32x1xf32>
    %c0_33 = arith.constant 0 : index
    %c6_34 = arith.constant 6 : index
    %202 = vector.load %arg6[%c0_33, %c6_34] : memref<32x12xf32, #tpu.memory_space<vmem>>, vector<32x1xf32>
    tpu.vector_store %arg6[%c0_33, %c6_34], %201 {strides = array<i32>} : memref<32x12xf32, #tpu.memory_space<vmem>>, vector<32x1xf32>,
    %c0_35 = arith.constant 0 : index
    %c7 = arith.constant 7 : index
    %203 = vector.load %arg1[%c0_35, %c7] : memref<32x8xf32, #tpu.memory_space<vmem>>, vector<32x1xf32>
    %204 = vector.broadcast %203 : vector<32x1xf32> to vector<32x4xf32>
    %205 = arith.mulf %204, %2 : vector<32x4xf32>
    %206 = vector.extract_strided_slice %200 {offsets = [0, 0], sizes = [32, 4], strides = [1, 1]} : vector<32x5xf32> to vector<32x4xf32>
    %207 = arith.addf %205, %206 : vector<32x4xf32>
    %208 = math.tanh %207 : vector<32x4xf32>
    %209 = vector.extract_strided_slice %208 {offsets = [0, 0], sizes = [32, 1], strides = [1, 1]} : vector<32x4xf32> to vector<32x1xf32>
    %210 = vector.broadcast %209 : vector<32x1xf32> to vector<32x5xf32>
    %211 = arith.mulf %210, %8 : vector<32x5xf32>
    %212 = arith.addf %5, %211 : vector<32x5xf32>
    %213 = vector.extract_strided_slice %208 {offsets = [0, 1], sizes = [32, 1], strides = [1, 1]} : vector<32x4xf32> to vector<32x1xf32>
    %214 = vector.broadcast %213 : vector<32x1xf32> to vector<32x5xf32>
    %215 = arith.mulf %214, %11 : vector<32x5xf32>
    %216 = arith.addf %212, %215 : vector<32x5xf32>
    %217 = vector.extract_strided_slice %208 {offsets = [0, 2], sizes = [32, 1], strides = [1, 1]} : vector<32x4xf32> to vector<32x1xf32>
    %218 = vector.broadcast %217 : vector<32x1xf32> to vector<32x5xf32>
    %219 = arith.mulf %218, %14 : vector<32x5xf32>
    %220 = arith.addf %216, %219 : vector<32x5xf32>
    %221 = vector.extract_strided_slice %208 {offsets = [0, 3], sizes = [32, 1], strides = [1, 1]} : vector<32x4xf32> to vector<32x1xf32>
    %222 = vector.broadcast %221 : vector<32x1xf32> to vector<32x5xf32>
    %223 = arith.mulf %222, %17 : vector<32x5xf32>
    %224 = arith.addf %220, %223 : vector<32x5xf32>
    %225 = vector.extract_strided_slice %224 {offsets = [0, 4], sizes = [32, 1], strides = [1, 1]} : vector<32x5xf32> to vector<32x1xf32>
    %c0_36 = arith.constant 0 : index
    %c7_37 = arith.constant 7 : index
    %226 = vector.load %arg6[%c0_36, %c7_37] : memref<32x12xf32, #tpu.memory_space<vmem>>, vector<32x1xf32>
    tpu.vector_store %arg6[%c0_36, %c7_37], %225 {strides = array<i32>} : memref<32x12xf32, #tpu.memory_space<vmem>>, vector<32x1xf32>,
    %227 = vector.broadcast %225 : vector<32x1xf32> to vector<32x4xf32>
    %228 = arith.mulf %227, %2 : vector<32x4xf32>
    %229 = vector.extract_strided_slice %224 {offsets = [0, 0], sizes = [32, 4], strides = [1, 1]} : vector<32x5xf32> to vector<32x4xf32>
    %230 = arith.addf %228, %229 : vector<32x4xf32>
    %231 = math.tanh %230 : vector<32x4xf32>
    %232 = vector.extract_strided_slice %231 {offsets = [0, 0], sizes = [32, 1], strides = [1, 1]} : vector<32x4xf32> to vector<32x1xf32>
    %233 = vector.broadcast %232 : vector<32x1xf32> to vector<32x5xf32>
    %234 = arith.mulf %233, %8 : vector<32x5xf32>
    %235 = arith.addf %5, %234 : vector<32x5xf32>
    %236 = vector.extract_strided_slice %231 {offsets = [0, 1], sizes = [32, 1], strides = [1, 1]} : vector<32x4xf32> to vector<32x1xf32>
    %237 = vector.broadcast %236 : vector<32x1xf32> to vector<32x5xf32>
    %238 = arith.mulf %237, %11 : vector<32x5xf32>
    %239 = arith.addf %235, %238 : vector<32x5xf32>
    %240 = vector.extract_strided_slice %231 {offsets = [0, 2], sizes = [32, 1], strides = [1, 1]} : vector<32x4xf32> to vector<32x1xf32>
    %241 = vector.broadcast %240 : vector<32x1xf32> to vector<32x5xf32>
    %242 = arith.mulf %241, %14 : vector<32x5xf32>
    %243 = arith.addf %239, %242 : vector<32x5xf32>
    %244 = vector.extract_strided_slice %231 {offsets = [0, 3], sizes = [32, 1], strides = [1, 1]} : vector<32x4xf32> to vector<32x1xf32>
    %245 = vector.broadcast %244 : vector<32x1xf32> to vector<32x5xf32>
    %246 = arith.mulf %245, %17 : vector<32x5xf32>
    %247 = arith.addf %243, %246 : vector<32x5xf32>
    %248 = vector.extract_strided_slice %247 {offsets = [0, 4], sizes = [32, 1], strides = [1, 1]} : vector<32x5xf32> to vector<32x1xf32>
    %c0_38 = arith.constant 0 : index
    %c8 = arith.constant 8 : index
    %249 = vector.load %arg6[%c0_38, %c8] : memref<32x12xf32, #tpu.memory_space<vmem>>, vector<32x1xf32>
    tpu.vector_store %arg6[%c0_38, %c8], %248 {strides = array<i32>} : memref<32x12xf32, #tpu.memory_space<vmem>>, vector<32x1xf32>,
    %250 = vector.broadcast %248 : vector<32x1xf32> to vector<32x4xf32>
    %251 = arith.mulf %250, %2 : vector<32x4xf32>
    %252 = vector.extract_strided_slice %247 {offsets = [0, 0], sizes = [32, 4], strides = [1, 1]} : vector<32x5xf32> to vector<32x4xf32>
    %253 = arith.addf %251, %252 : vector<32x4xf32>
    %254 = math.tanh %253 : vector<32x4xf32>
    %255 = vector.extract_strided_slice %254 {offsets = [0, 0], sizes = [32, 1], strides = [1, 1]} : vector<32x4xf32> to vector<32x1xf32>
    %256 = vector.broadcast %255 : vector<32x1xf32> to vector<32x5xf32>
    %257 = arith.mulf %256, %8 : vector<32x5xf32>
    %258 = arith.addf %5, %257 : vector<32x5xf32>
    %259 = vector.extract_strided_slice %254 {offsets = [0, 1], sizes = [32, 1], strides = [1, 1]} : vector<32x4xf32> to vector<32x1xf32>
    %260 = vector.broadcast %259 : vector<32x1xf32> to vector<32x5xf32>
    %261 = arith.mulf %260, %11 : vector<32x5xf32>
    %262 = arith.addf %258, %261 : vector<32x5xf32>
    %263 = vector.extract_strided_slice %254 {offsets = [0, 2], sizes = [32, 1], strides = [1, 1]} : vector<32x4xf32> to vector<32x1xf32>
    %264 = vector.broadcast %263 : vector<32x1xf32> to vector<32x5xf32>
    %265 = arith.mulf %264, %14 : vector<32x5xf32>
    %266 = arith.addf %262, %265 : vector<32x5xf32>
    %267 = vector.extract_strided_slice %254 {offsets = [0, 3], sizes = [32, 1], strides = [1, 1]} : vector<32x4xf32> to vector<32x1xf32>
    %268 = vector.broadcast %267 : vector<32x1xf32> to vector<32x5xf32>
    %269 = arith.mulf %268, %17 : vector<32x5xf32>
    %270 = arith.addf %266, %269 : vector<32x5xf32>
    %271 = vector.extract_strided_slice %270 {offsets = [0, 4], sizes = [32, 1], strides = [1, 1]} : vector<32x5xf32> to vector<32x1xf32>
    %c0_39 = arith.constant 0 : index
    %c9 = arith.constant 9 : index
    %272 = vector.load %arg6[%c0_39, %c9] : memref<32x12xf32, #tpu.memory_space<vmem>>, vector<32x1xf32>
    tpu.vector_store %arg6[%c0_39, %c9], %271 {strides = array<i32>} : memref<32x12xf32, #tpu.memory_space<vmem>>, vector<32x1xf32>,
    %273 = vector.broadcast %271 : vector<32x1xf32> to vector<32x4xf32>
    %274 = arith.mulf %273, %2 : vector<32x4xf32>
    %275 = vector.extract_strided_slice %270 {offsets = [0, 0], sizes = [32, 4], strides = [1, 1]} : vector<32x5xf32> to vector<32x4xf32>
    %276 = arith.addf %274, %275 : vector<32x4xf32>
    %277 = math.tanh %276 : vector<32x4xf32>
    %278 = vector.extract_strided_slice %277 {offsets = [0, 0], sizes = [32, 1], strides = [1, 1]} : vector<32x4xf32> to vector<32x1xf32>
    %279 = vector.broadcast %278 : vector<32x1xf32> to vector<32x5xf32>
    %280 = arith.mulf %279, %8 : vector<32x5xf32>
    %281 = arith.addf %5, %280 : vector<32x5xf32>
    %282 = vector.extract_strided_slice %277 {offsets = [0, 1], sizes = [32, 1], strides = [1, 1]} : vector<32x4xf32> to vector<32x1xf32>
    %283 = vector.broadcast %282 : vector<32x1xf32> to vector<32x5xf32>
    %284 = arith.mulf %283, %11 : vector<32x5xf32>
    %285 = arith.addf %281, %284 : vector<32x5xf32>
    %286 = vector.extract_strided_slice %277 {offsets = [0, 2], sizes = [32, 1], strides = [1, 1]} : vector<32x4xf32> to vector<32x1xf32>
    %287 = vector.broadcast %286 : vector<32x1xf32> to vector<32x5xf32>
    %288 = arith.mulf %287, %14 : vector<32x5xf32>
    %289 = arith.addf %285, %288 : vector<32x5xf32>
    %290 = vector.extract_strided_slice %277 {offsets = [0, 3], sizes = [32, 1], strides = [1, 1]} : vector<32x4xf32> to vector<32x1xf32>
    %291 = vector.broadcast %290 : vector<32x1xf32> to vector<32x5xf32>
    %292 = arith.mulf %291, %17 : vector<32x5xf32>
    %293 = arith.addf %289, %292 : vector<32x5xf32>
    %294 = vector.extract_strided_slice %293 {offsets = [0, 4], sizes = [32, 1], strides = [1, 1]} : vector<32x5xf32> to vector<32x1xf32>
    %c0_40 = arith.constant 0 : index
    %c10 = arith.constant 10 : index
    %295 = vector.load %arg6[%c0_40, %c10] : memref<32x12xf32, #tpu.memory_space<vmem>>, vector<32x1xf32>
    tpu.vector_store %arg6[%c0_40, %c10], %294 {strides = array<i32>} : memref<32x12xf32, #tpu.memory_space<vmem>>, vector<32x1xf32>,
    %296 = vector.broadcast %294 : vector<32x1xf32> to vector<32x4xf32>
    %297 = arith.mulf %296, %2 : vector<32x4xf32>
    %298 = vector.extract_strided_slice %293 {offsets = [0, 0], sizes = [32, 4], strides = [1, 1]} : vector<32x5xf32> to vector<32x4xf32>
    %299 = arith.addf %297, %298 : vector<32x4xf32>
    %300 = math.tanh %299 : vector<32x4xf32>
    %301 = vector.extract_strided_slice %300 {offsets = [0, 0], sizes = [32, 1], strides = [1, 1]} : vector<32x4xf32> to vector<32x1xf32>
    %302 = vector.broadcast %301 : vector<32x1xf32> to vector<32x5xf32>
    %303 = arith.mulf %302, %8 : vector<32x5xf32>
    %304 = arith.addf %5, %303 : vector<32x5xf32>
    %305 = vector.extract_strided_slice %300 {offsets = [0, 1], sizes = [32, 1], strides = [1, 1]} : vector<32x4xf32> to vector<32x1xf32>
    %306 = vector.broadcast %305 : vector<32x1xf32> to vector<32x5xf32>
    %307 = arith.mulf %306, %11 : vector<32x5xf32>
    %308 = arith.addf %304, %307 : vector<32x5xf32>
    %309 = vector.extract_strided_slice %300 {offsets = [0, 2], sizes = [32, 1], strides = [1, 1]} : vector<32x4xf32> to vector<32x1xf32>
    %310 = vector.broadcast %309 : vector<32x1xf32> to vector<32x5xf32>
    %311 = arith.mulf %310, %14 : vector<32x5xf32>
    %312 = arith.addf %308, %311 : vector<32x5xf32>
    %313 = vector.extract_strided_slice %300 {offsets = [0, 3], sizes = [32, 1], strides = [1, 1]} : vector<32x4xf32> to vector<32x1xf32>
    %314 = vector.broadcast %313 : vector<32x1xf32> to vector<32x5xf32>
    %315 = arith.mulf %314, %17 : vector<32x5xf32>
    %316 = arith.addf %312, %315 : vector<32x5xf32>
    %317 = vector.extract_strided_slice %316 {offsets = [0, 4], sizes = [32, 1], strides = [1, 1]} : vector<32x5xf32> to vector<32x1xf32>
    %c0_41 = arith.constant 0 : index
    %c11 = arith.constant 11 : index
    %318 = vector.load %arg6[%c0_41, %c11] : memref<32x12xf32, #tpu.memory_space<vmem>>, vector<32x1xf32>
    tpu.vector_store %arg6[%c0_41, %c11], %317 {strides = array<i32>} : memref<32x12xf32, #tpu.memory_space<vmem>>, vector<32x1xf32>,
    return
  }
  func.func @transform_0(%arg0: i32) -> (i32, i32) {
    %c0_i32 = arith.constant 0 : i32
    %c0_i32_0 = arith.constant 0 : i32
    return %arg0, %c0_i32 : i32, i32
  }
  func.func @transform_1(%arg0: i32) -> (i32, i32) {
    %c0_i32 = arith.constant 0 : i32
    %c0_i32_0 = arith.constant 0 : i32
    return %arg0, %c0_i32 : i32, i32
  }
  func.func @transform_2(%arg0: i32) -> (i32, i32) {
    %c0_i32 = arith.constant 0 : i32
    %c0_i32_0 = arith.constant 0 : i32
    %c0_i32_1 = arith.constant 0 : i32
    return %c0_i32, %c0_i32_0 : i32, i32
  }
  func.func @transform_3(%arg0: i32) -> (i32, i32) {
    %c0_i32 = arith.constant 0 : i32
    %c0_i32_0 = arith.constant 0 : i32
    %c0_i32_1 = arith.constant 0 : i32
    return %c0_i32, %c0_i32_0 : i32, i32
  }
  func.func @transform_4(%arg0: i32) -> (i32, i32) {
    %c0_i32 = arith.constant 0 : i32
    %c0_i32_0 = arith.constant 0 : i32
    %c0_i32_1 = arith.constant 0 : i32
    return %c0_i32, %c0_i32_0 : i32, i32
  }
  func.func @transform_5(%arg0: i32) -> (i32, i32) {
    %c0_i32 = arith.constant 0 : i32
    %c0_i32_0 = arith.constant 0 : i32
    return %arg0, %c0_i32 : i32, i32
  }
}

</mosaic_0001>

<bundles_post_ra>
// kernel: tpu_custom_call.1
= control target key start
LH: loop header
LB: loop body
LE: loop exit
PB: predicated region body
PF: predicated region fallthrough
CT: control target
= control target key end

     0   :  { %v2290_v0 = vmov 1   ;;  %v2291_v1 = vmov 0   ;;  %v2292_v7 = vmov 2   ;;  %v2293_v9 = vmov 3   ;;  %s2298_s20 = smov 124   ;;  %s2299_s29 = smov 125   ;;  %s3238_s1 = inlined_call_operand.vmem [shape: f32[32,4], index: 1, kind: input, shape index: {}]   ;;  %s3239_s3 = inlined_call_operand.vmem [shape: f32[4,5], index: 3, kind: input, shape index: {}]   ;;  %s3240_s4 = inlined_call_operand.vmem [shape: f32[1,5], index: 4, kind: input, shape index: {}]   ;;  %s3241_s2 = inlined_call_operand.vmem [shape: f32[1,4], index: 2, kind: input, shape index: {}]   ;;  %s3242_s0 = inlined_call_operand.vmem [shape: f32[32,8], index: 0, kind: input, shape index: {}]   ;;  %s3243_s5 = inlined_call_operand.vmem [shape: f32[32,12], index: 5, kind: output, shape index: {}]  }
   0x1   :  { %2001 = vset.pattern.permute.xlu0 %v2290_v0  ;;  %1999 = vset.pattern.permute.xlu1 %v2291_v1  ;;  %v38_v2 = vld [vmem:[%s3238_s1 + $0x10] sm:$0xff]  ;;  %v36_v3 = vld [vmem:[%s3238_s1] sm:$0xff]  ;;  %v39_v4 = vld [vmem:[%s3238_s1 + $0x18] sm:$0xff]  ;;  %vm292_vm0 = vcmask 7168   ;;  %vm449_vm1 = vcmask 15368   ;;  %s2300_s12 = smov 126  }
   0x2   :  { %77 = vperm.xlu0 %2001, %v38_v2   ;;  %52 = vperm.xlu1 %1999, %v38_v2   ;;  %v2354_v5 = vld [vmem:[%s3242_s0 + $0x10] sm:$0xff]  ;;  %v37_v6 = vld [vmem:[%s3238_s1 + $0x8] sm:$0xff]  ;;  %v2376_v10 = vld [vmem:[%s3242_s0] sm:$0xff]  ;;  %vm606_vm2 = vcmask 23568   ;;  %s2301_s21 = smov 127   ;;  %vm763_vm3 = vcmask 31768  }
   0x3   :  { %2000 = vset.pattern.permute.xlu2 %v2290_v0  ;;  %v2366_v8 = vld [vmem:[%s3242_s0 + $0x8] sm:$0xff]  ;;  %v2386_v11 = vld [vmem:[%s3242_s0 + $0x18] sm:$0xff]  ;;  %v2405_v25 = vld [vmem:[%s3239_s3] ss:$0 sm:$0xff]  ;;  %vm904_vm4 = vcmask 39968   ;;  %s2302_s24 = smov 1  }
   0x4   :  { %69 = vperm.xlu2 %2000, %v36_v3   ;;  %v2410_v26 = vld [vmem:[%s3240_s4] ss:$0 sm:$0xff]  ;;  %v2416_v29 = vld [vmem:[%s3239_s3 + $0x1] ss:$0 sm:$0xff]  ;;  %v2422_v33 = vld [vmem:[%s3239_s3 + $0x2] ss:$0 sm:$0xff] }
   0x5   :  { %v2432_v41 = vld [vmem:[%s3241_s2] ss:$0 sm:$0xff]  ;;  %v2437_v42 = vld [vmem:[%s3239_s3 + $0x3] ss:$0 sm:$0xff]  ;;  %vm1061_vm5 = vcmask 48168   ;;  %vm1218_vm6 = vcmask 56368  }
   0x6   :  { %vm1375_vm7 = vcmask 64568   ;;  %s2305_s6 = smov 4   ;;  %vm1524_vm8 = vcmask 72768   ;;  %s2306_s22 = smov 5   ;;  %vm1673_vm9 = vcmask 80968   ;;  %vm1822_vm10 = vcmask 89168  }
   0x7   :  { %s2307_s1 = smov 6   ;;  %s2308_s11 = smov 7   ;;  %vm1971_vm11 = vcmask 97368  }
   0xa   :  { %57 = vperm.xlu1 %1999, %v39_v4   ;;  %313 = vperm.xlu0 %2001, %v2354_v5  }
   0xc   :  { %73 = vperm.xlu2 %2000, %v37_v6  }
  0x12   :  { %2002 = vset.pattern.permute.xlu1 %v2290_v0  ;;  %2011 = vset.pattern.permute.xlu0 %v2292_v7 }
  0x13   :  { %81 = vperm.xlu1 %2002, %v39_v4   ;;  %105 = vperm.xlu0 %2011, %v39_v4  }
  0x14   :  { %2003 = vset.pattern.permute.xlu2 %v2292_v7 }
  0x15   :  { %93 = vperm.xlu2 %2003, %v36_v3  }
  0x1b   :  { %2004 = vset.pattern.permute.xlu1 %v2292_v7  ;;  %465 = vperm.xlu0 %2011, %v2366_v8  }
  0x1c   :  { %97 = vperm.xlu1 %2004, %v37_v6  }
  0x1d   :  { %101 = vperm.xlu2 %2003, %v38_v2  }
  0x23   :  { %2013 = vset.pattern.permute.xlu0 %v2291_v1 }
  0x24   :  { %2005 = vset.pattern.permute.xlu1 %v2293_v9  ;;  %42 = vperm.xlu0 %2013, %v36_v3  }
  0x25   :  { %117 = vperm.xlu1 %2005, %v36_v3   ;;  %2006 = vset.pattern.permute.xlu2 %v2293_v9 }
  0x26   :  { %121 = vperm.xlu2 %2006, %v37_v6  }
  0x2c   :  { %47 = vperm.xlu0 %2013, %v37_v6  }
  0x2d   :  { %125 = vperm.xlu1 %2005, %v38_v2  }
  0x2e   :  { %129 = vperm.xlu2 %2006, %v39_v4  }
  0x34   :  { %146 = vperm.xlu0 %2013, %v2376_v10  }
  0x35   :  { %2007 = vset.pattern.permute.xlu1 %v2291_v1 }
  0x36   :  { %151 = vperm.xlu1 %2007, %v2366_v8   ;;  %2008 = vset.pattern.permute.xlu2 %v2291_v1 }
  0x37   :  { %156 = vperm.xlu2 %2008, %v2354_v5  }
  0x3e   :  { %161 = vperm.xlu1 %2007, %v2386_v11  }
  0x3f   :  { %2010 = vset.pattern.permute.xlu2 %v2290_v0 }
  0x40   :  { %308 = vperm.xlu2 %2010, %v2366_v8  }
  0x46   :  { %2009 = vset.pattern.permute.xlu1 %v2290_v0 }
  0x47   :  { %303 = vperm.xlu1 %2009, %v2376_v10  }
  0x48   :  { %2012 = vset.pattern.permute.xlu2 %v2292_v7 }
  0x49   :  { %460 = vperm.xlu2 %2012, %v2376_v10  }
  0x4f   :  { %318 = vperm.xlu1 %2009, %v2386_v11  }
  0x51   :  { %2014 = vset.pattern.permute.xlu2 %v2291_v1 }
  0x57   :  { %2015 = vset.pattern.permute.xlu1 %v2291_v1 }
  0x5e   :  { %v70_v12 = vpop.permute.xlu2 %69 }
  0x5f   :  { %v84_v39 = vmul.f32 %v2416_v29, %v70_v12 }
  0x66   :  { %v74_v13 = vpop.permute.xlu2 %73 }
  0x67   :  { %v85_v50 = vmul.f32 %v2416_v29, %v74_v13 }
  0x6f   :  { %v94_v16 = vpop.permute.xlu2 %93 }
  0x70   :  { %v108_v51 = vmul.f32 %v2422_v33, %v94_v16 }
  0x74   :  { %v78_v14 = vpop.permute.xlu0 %77  ;;  %v53_v15 = vpop.permute.xlu1 %52 }
  0x75   :  { %v62_v27 = vmul.f32 %v2405_v25, %v53_v15  ;;  %v86_v34 = vmul.f32 %v2416_v29, %v78_v14 }
  0x77   :  { %v102_v19 = vpop.permute.xlu2 %101  ;;  %v66_v35 = vadd.f32 %v2410_v26, %v62_v27 }
  0x78   :  { %v110_v38 = vmul.f32 %v2422_v33, %v102_v19 }
  0x79   :  { %v90_v37 = vadd.f32 %v86_v34, %v66_v35 }
  0x7b   :  { %v114_v47 = vadd.f32 %v110_v38, %v90_v37  ;;  %v2296_v38 = vmov 6  }
  0x7c   :  { %v58_v17 = vpop.permute.xlu1 %57  ;;  %v2398_v18 = vpop.permute.xlu0 %313 }
  0x7d   :  { %v63_v54 = vmul.f32 %v2405_v25, %v58_v17 }
  0x7f   :  { %v67_v63 = vadd.f32 %v2410_v26, %v63_v54 }
  0x80   :  { %v122_v22 = vpop.permute.xlu2 %121 }
  0x81   :  { %v133_v2 = vmul.f32 %v2437_v42, %v122_v22 }
  0x85   :  { %v82_v20 = vpop.permute.xlu1 %81  ;;  %v106_v21 = vpop.permute.xlu0 %105 }
  0x86   :  { %v87_v59 = vmul.f32 %v2416_v29, %v82_v20  ;;  %v111_v6 = vmul.f32 %v2422_v33, %v106_v21 }
  0x88   :  { %v130_v28 = vpop.permute.xlu2 %129  ;;  %v91_v13 = vadd.f32 %v87_v59, %v67_v63 }
  0x8a   :  { %v115_v20 = vadd.f32 %v111_v6, %v91_v13 }
  0x8d   :  { %v2400_v23 = vpop.permute.xlu0 %465 }
  0x8e   :  { %v98_v24 = vpop.permute.xlu1 %97 }
  0x8f   :  { %v109_v55 = vmul.f32 %v2422_v33, %v98_v24  ;;  %v135_v24 = vmul.f32 %v2437_v42, %v130_v28  ;;  %v2294_v28 = vmov 4  }
  0x91   :  { %v157_v40 = vpop.permute.xlu2 %156 }
  0x92   :  { %v166_v49 = vmul.f32 %v2432_v41, %v157_v40 }
  0x96   :  { %v43_v30 = vpop.permute.xlu0 %42 }
  0x97   :  { %v60_v31 = vmul.f32 %v2405_v25, %v43_v30  ;;  %v118_v32 = vpop.permute.xlu1 %117  ;;  %v139_v30 = vadd.f32 %v135_v24, %v115_v20 }
  0x98   :  { %v132_v60 = vmul.f32 %v2437_v42, %v118_v32 }
  0x99   :  { %v64_v36 = vadd.f32 %v2410_v26, %v60_v31 }
  0x9a   :  { %v309_v35 = vpop.permute.xlu2 %308 }
  0x9b   :  { %v88_v44 = vadd.f32 %v84_v39, %v64_v36  ;;  %v2295_v36 = vmov 5  }
  0x9d   :  { %v112_v56 = vadd.f32 %v108_v51, %v88_v44 }
  0x9e   :  { %v48_v43 = vpop.permute.xlu0 %47 }
  0x9f   :  { %v61_v45 = vmul.f32 %v2405_v25, %v48_v43  ;;  %v126_v46 = vpop.permute.xlu1 %125  ;;  %v136_v3 = vadd.f32 %v132_v60, %v112_v56 }
  0xa0   :  { %v134_v48 = vmul.f32 %v2437_v42, %v126_v46 }
  0xa1   :  { %v65_v52 = vadd.f32 %v2410_v26, %v61_v45  ;;  %v2297_v45 = vmov 7  }
  0xa2   :  { %v138_v53 = vadd.f32 %v134_v48, %v114_v47 }
  0xa3   :  { %v89_v57 = vadd.f32 %v85_v50, %v65_v52  ;;  %v2484_v37 = vpop.permute.xlu2 %460 }
  0xa4   :  { %v170_v58 = vadd.f32 %v166_v49, %v138_v53 }
  0xa5   :  { %v113_v61 = vadd.f32 %v109_v55, %v89_v57 }
  0xa6   :  { %2182 = vtanh.f32 %v170_v58  ;;  %v147_v62 = vpop.permute.xlu0 %146 }
  0xa7   :  { %v164_v4 = vmul.f32 %v2432_v41, %v147_v62  ;;  %v137_v15 = vadd.f32 %v133_v2, %v113_v61  ;;  %v322_v62 = vmul.f32 %v2432_v41, %v309_v35 }
  0xa8   :  { %v152_v12 = vpop.permute.xlu1 %151 }
  0xa9   :  { %v168_v14 = vadd.f32 %v164_v4, %v136_v3  ;;  %v165_v16 = vmul.f32 %v2432_v41, %v152_v12 }
  0xab   :  { %2184 = vtanh.f32 %v168_v14  ;;  %v169_v17 = vadd.f32 %v165_v16, %v137_v15 }
  0xac   :  { %v2183_v19 = vpop.eup %2182 }
  0xad   :  { %2186 = vtanh.f32 %v169_v17  ;;  %188 = vperm.xlu1 %2015, %v2183_v19  }
  0xb0   :  { %v162_v22 = vpop.permute.xlu1 %161 }
  0xb1   :  { %v2185_v27 = vpop.eup %2184  ;;  %v167_v31 = vmul.f32 %v2432_v41, %v162_v22 }
  0xb2   :  { %178 = vperm.xlu2 %2014, %v2185_v27  }
  0xb3   :  { %v2187_v21 = vpop.eup %2186  ;;  %v171_v32 = vadd.f32 %v167_v31, %v139_v30 }
  0xb4   :  { %183 = vperm.xlu0 %2013, %v2187_v21  }
  0xb5   :  { %2188 = vtanh.f32 %v171_v32  ;;  %2017 = vset.pattern.permute.xlu1 %v2290_v0 }
  0xb6   :  { %209 = vperm.xlu1 %2017, %v2187_v21  }
  0xb9   :  { %v304_v39 = vpop.permute.xlu1 %303 }
  0xba   :  { %v321_v24 = vmul.f32 %v2432_v41, %v304_v39 }
  0xbb   :  { %v2189_v34 = vpop.eup %2188 }
  0xbc   :  { %2016 = vset.pattern.permute.xlu0 %v2290_v0  ;;  %193 = vperm.xlu2 %2014, %v2189_v34  }
  0xbd   :  { %205 = vperm.xlu0 %2016, %v2185_v27  }
  0xbe   :  { %217 = vperm.xlu1 %2017, %v2189_v34  }
  0xc1   :  { %v2494_v44 = vpop.permute.xlu1 %318 }
  0xc4   :  { %2018 = vset.pattern.permute.xlu2 %v2290_v0 }
  0xc5   :  { %2020 = vset.pattern.permute.xlu0 %v2292_v7  ;;  %213 = vperm.xlu2 %2018, %v2183_v19  }
  0xc6   :  { %2021 = vset.pattern.permute.xlu1 %v2292_v7  ;;  %233 = vperm.xlu0 %2020, %v2187_v21  }
  0xc7   :  { %237 = vperm.xlu1 %2021, %v2183_v19  }
  0xcd   :  { %2019 = vset.pattern.permute.xlu2 %v2292_v7 }
  0xce   :  { %2024 = vset.pattern.permute.xlu0 %v2293_v9  ;;  %229 = vperm.xlu2 %2019, %v2185_v27  }
  0xcf   :  { %2022 = vset.pattern.permute.xlu1 %v2293_v9  ;;  %261 = vperm.xlu0 %2024, %v2183_v19  }
  0xd0   :  { %253 = vperm.xlu1 %2022, %v2185_v27  }
  0xd6   :  { %241 = vperm.xlu2 %2019, %v2189_v34  }
  0xd7   :  { %617 = vperm.xlu0 %2024, %v2376_v10  }
  0xd8   :  { %2025 = vset.pattern.permute.xlu1 %v2292_v7 }
  0xd9   :  { %470 = vperm.xlu1 %2025, %v2354_v5  }
  0xde   :  { %2023 = vset.pattern.permute.xlu2 %v2293_v9 }
  0xdf   :  { %257 = vperm.xlu2 %2023, %v2187_v21   ;;  %632 = vperm.xlu0 %2024, %v2386_v11  }
  0xe1   :  { %2027 = vset.pattern.permute.xlu1 %v2293_v9 }
  0xe2   :  { %622 = vperm.xlu1 %2027, %v2366_v8  }
  0xe7   :  { %2026 = vset.pattern.permute.xlu2 %v2292_v7  ;;  %2029 = vset.pattern.permute.xlu0 %v2294_v28 }
  0xe8   :  { %475 = vperm.xlu2 %2026, %v2386_v11   ;;  %774 = vperm.xlu0 %2029, %v2376_v10  }
  0xea   :  { %265 = vperm.xlu1 %2027, %v2189_v34  }
  0xf0   :  { %2028 = vset.pattern.permute.xlu2 %v2293_v9  ;;  %2032 = vset.pattern.permute.xlu0 %v2295_v36 }
  0xf1   :  { %627 = vperm.xlu2 %2028, %v2354_v5   ;;  %915 = vperm.xlu0 %2032, %v2376_v10  }
  0xf2   :  { %2030 = vset.pattern.permute.xlu1 %v2294_v28 }
  0xf3   :  { %779 = vperm.xlu1 %2030, %v2366_v8  }
  0xf9   :  { %2031 = vset.pattern.permute.xlu2 %v2294_v28  ;;  %2037 = vset.pattern.permute.xlu0 %v2296_v38 }
  0xfa   :  { %784 = vperm.xlu2 %2031, %v2354_v5   ;;  %1082 = vperm.xlu0 %2037, %v2354_v5  }
  0xfb   :  { %789 = vperm.xlu1 %2030, %v2386_v11  }
 0x102   :  { %2034 = vset.pattern.permute.xlu2 %v2295_v36  ;;  %2041 = vset.pattern.permute.xlu0 %v2291_v1 }
 0x103   :  { %2033 = vset.pattern.permute.xlu1 %v2295_v36  ;;  %925 = vperm.xlu2 %2034, %v2354_v5   ;;  %v323_v36 = vmul.f32 %v2432_v41, %v2398_v18 }
 0x104   :  { %920 = vperm.xlu1 %2033, %v2366_v8  }
 0x10b   :  { %2036 = vset.pattern.permute.xlu2 %v2296_v38 }
 0x10c   :  { %930 = vperm.xlu1 %2033, %v2386_v11   ;;  %1077 = vperm.xlu2 %2036, %v2366_v8   ;;  %v179_v40 = vpop.permute.xlu2 %178 }
 0x10d   :  { %v196_v55 = vmul.f32 %v2405_v25, %v179_v40 }
 0x10f   :  { %v200_v63 = vadd.f32 %v2410_v26, %v196_v55 }
 0x114   :  { %2035 = vset.pattern.permute.xlu1 %v2296_v38  ;;  %2038 = vset.pattern.permute.xlu2 %v2297_v45 }
 0x115   :  { %1072 = vperm.xlu1 %2035, %v2376_v10   ;;  %1229 = vperm.xlu2 %2038, %v2376_v10  }
 0x116   :  { %v2491_v43 = vpop.permute.xlu2 %193 }
 0x117   :  { %v199_v39 = vmul.f32 %v2405_v25, %v2491_v43 }
 0x11d   :  { %1087 = vperm.xlu1 %2035, %v2386_v11   ;;  %2039 = vset.pattern.permute.xlu2 %v2291_v1 }
 0x11f   :  { %v189_v46 = vpop.permute.xlu1 %188  ;;  %v214_v8 = vpop.permute.xlu2 %213 }
 0x120   :  { %v198_v3 = vmul.f32 %v2405_v25, %v189_v46  ;;  %v222_v19 = vmul.f32 %v2416_v29, %v214_v8 }
 0x122   :  { %v202_v13 = vadd.f32 %v2410_v26, %v198_v3 }
 0x124   :  { %v226_v27 = vadd.f32 %v222_v19, %v202_v13 }
 0x125   :  { %2040 = vset.pattern.permute.xlu1 %v2291_v1 }
 0x126   :  { %v184_v5 = vpop.permute.xlu0 %183 }
 0x127   :  { %v197_v52 = vmul.f32 %v2405_v25, %v184_v5  ;;  %v203_v5 = vadd.f32 %v2410_v26, %v199_v39 }
 0x128   :  { %v210_v47 = vpop.permute.xlu1 %209  ;;  %v230_v48 = vpop.permute.xlu2 %229 }
 0x129   :  { %v201_v11 = vadd.f32 %v2410_v26, %v197_v52  ;;  %v221_v53 = vmul.f32 %v2416_v29, %v210_v47  ;;  %v244_v12 = vmul.f32 %v2422_v33, %v230_v48 }
 0x12b   :  { %v225_v10 = vadd.f32 %v221_v53, %v201_v11  ;;  %v324_v53 = vmul.f32 %v2432_v41, %v2494_v44 }
 0x12f   :  { %v206_v49 = vpop.permute.xlu0 %205 }
 0x130   :  { %v218_v50 = vpop.permute.xlu1 %217  ;;  %v242_v51 = vpop.permute.xlu2 %241  ;;  %v220_v60 = vmul.f32 %v2416_v29, %v206_v49 }
 0x131   :  { %v223_v8 = vmul.f32 %v2416_v29, %v218_v50  ;;  %v247_v48 = vmul.f32 %v2422_v33, %v242_v51 }
 0x132   :  { %v224_v4 = vadd.f32 %v220_v60, %v200_v63 }
 0x133   :  { %v227_v18 = vadd.f32 %v223_v8, %v203_v5 }
 0x134   :  { %v248_v16 = vadd.f32 %v244_v12, %v224_v4 }
 0x135   :  { %v251_v52 = vadd.f32 %v247_v48, %v227_v18 }
 0x138   :  { %v234_v54 = vpop.permute.xlu0 %233 }
 0x139   :  { %v245_v56 = vmul.f32 %v2422_v33, %v234_v54  ;;  %v238_v57 = vpop.permute.xlu1 %237  ;;  %v258_v58 = vpop.permute.xlu2 %257 }
 0x13a   :  { %v269_v59 = vmul.f32 %v2437_v42, %v258_v58  ;;  %v246_v20 = vmul.f32 %v2422_v33, %v238_v57 }
 0x13b   :  { %v249_v61 = vadd.f32 %v245_v56, %v225_v10 }
 0x13c   :  { %v250_v32 = vadd.f32 %v246_v20, %v226_v27 }
 0x13d   :  { %v273_v2 = vadd.f32 %v269_v59, %v249_v61 }
 0x13f   :  { %v326_v6 = vadd.f32 %v322_v62, %v273_v2  ;;  %282 = vrot.lane.b32.xlu1 %v273_v2, %s2298_s20 }
 0x141   :  { %2190 = vtanh.f32 %v326_v6  ;;  %v262_v15 = vpop.permute.xlu0 %261 }
 0x142   :  { %v254_v14 = vpop.permute.xlu1 %253  ;;  %v270_v30 = vmul.f32 %v2437_v42, %v262_v15  ;;  %v2538_v50 = vpop.permute.xlu2 %475 }
 0x143   :  { %v268_v17 = vmul.f32 %v2437_v42, %v254_v14 }
 0x144   :  { %v274_v34 = vadd.f32 %v270_v30, %v250_v32 }
 0x145   :  { %v272_v22 = vadd.f32 %v268_v17, %v248_v16 }
 0x146   :  { %v327_v38 = vadd.f32 %v323_v36, %v274_v34 }
 0x147   :  { %v2191_v31 = vpop.eup %2190  ;;  %v325_v21 = vadd.f32 %v321_v24, %v272_v22  ;;  %280 = vrot.lane.b32.xlu2 %v272_v22, %s2298_s20 }
 0x148   :  { %340 = vperm.xlu1 %2040, %v2191_v31  }
 0x149   :  { %2192 = vtanh.f32 %v325_v21  ;;  %v2573_v2 = vpop.permute.xlu0 %617 }
 0x14a   :  { %2194 = vtanh.f32 %v327_v38 }
 0x14b   :  { %v2520_v35 = vpop.permute.xlu1 %470  ;;  %v2541_v55 = vpop.permute.xlu2 %627 }
 0x14f   :  { %v2193_v40 = vpop.eup %2192  ;;  %284 = vrot.lane.b32.xlu2 %v274_v34, %s2298_s20 }
 0x150   :  { %2042 = vset.pattern.permute.xlu1 %v2290_v0  ;;  %v2195_v47 = vpop.eup %2194 }
 0x151   :  { %362 = vperm.xlu1 %2042, %v2193_v40   ;;  %v2581_v6 = vpop.permute.xlu0 %632 }
 0x154   :  { %v2528_v46 = vpop.permute.xlu1 %622  ;;  %v2548_v10 = vpop.permute.xlu2 %784 }
 0x157   :  { %335 = vperm.xlu2 %2039, %v2193_v40  }
 0x159   :  { %370 = vperm.xlu1 %2042, %v2195_v47  }
 0x15a   :  { %v2587_v14 = vpop.permute.xlu0 %774 }
 0x15c   :  { %v266_v49 = vpop.permute.xlu1 %265 }
 0x15d   :  { %v271_v11 = vmul.f32 %v2437_v42, %v266_v49  ;;  %v2555_v57 = vpop.permute.xlu2 %925 }
 0x15f   :  { %v275_v43 = vadd.f32 %v271_v11, %v251_v52  ;;  %345 = vperm.xlu2 %2039, %v2195_v47  }
 0x161   :  { %v328_v54 = vadd.f32 %v324_v53, %v275_v43  ;;  %286 = vrot.lane.b32.xlu0 %v275_v43, %s2298_s20  ;;  %2045 = vset.pattern.permute.xlu1 %v2292_v7 }
 0x162   :  { %390 = vperm.xlu1 %2045, %v2191_v31  }
 0x163   :  { %2196 = vtanh.f32 %v328_v54  ;;  %v2589_v17 = vpop.permute.xlu0 %915 }
 0x165   :  { %v2545_v44 = vpop.permute.xlu1 %779 }
 0x166   :  { %v2560_v59 = vpop.permute.xlu2 %1077 }
 0x167   :  { %2043 = vset.pattern.permute.xlu2 %v2290_v0 }
 0x168   :  { %366 = vperm.xlu2 %2043, %v2191_v31  }
 0x169   :  { %v2197_v51 = vpop.eup %2196 }
 0x16a   :  { %350 = vperm.xlu0 %2041, %v2197_v51   ;;  %398 = vperm.xlu1 %2045, %v2197_v51  }
 0x16c   :  { %v2591_v24 = vpop.permute.xlu0 %1082 }
 0x16d   :  { %v2552_v56 = vpop.permute.xlu1 %789 }
 0x16f   :  { %v2565_v61 = vpop.permute.xlu2 %1229 }
 0x170   :  { %374 = vperm.xlu2 %2043, %v2197_v51  }
 0x172   :  { %2044 = vset.pattern.permute.xlu0 %v2292_v7  ;;  %2049 = vset.pattern.permute.xlu1 %v2293_v9 }
 0x173   :  { %386 = vperm.xlu0 %2044, %v2193_v40   ;;  %418 = vperm.xlu1 %2049, %v2195_v47  }
 0x176   :  { %v2558_v58 = vpop.permute.xlu1 %920 }
 0x178   :  { %2046 = vset.pattern.permute.xlu2 %v2292_v7 }
 0x179   :  { %394 = vperm.xlu2 %2046, %v2195_v47  }
 0x17b   :  { %2048 = vset.pattern.permute.xlu0 %v2293_v9  ;;  %2050 = vset.pattern.permute.xlu1 %v2291_v1 }
 0x17c   :  { %414 = vperm.xlu0 %2048, %v2191_v31  }
 0x17e   :  { %v2563_v60 = vpop.permute.xlu1 %930 }
 0x181   :  { %2047 = vset.pattern.permute.xlu2 %v2293_v9 }
 0x182   :  { %410 = vperm.xlu2 %2047, %v2193_v40  }
 0x184   :  { %2052 = vset.pattern.permute.xlu0 %v2291_v1 }
 0x187   :  { %v2567_v62 = vpop.permute.xlu1 %1072 }
 0x18a   :  { %422 = vperm.xlu2 %2047, %v2197_v51  }
 0x18f   :  { %v2575_v3 = vpop.permute.xlu1 %1087 }
 0x192   :  { %2051 = vset.pattern.permute.xlu2 %v2291_v1 }
 0x1a1   :  { %v281_v63 = vpop.permute.xlu2 %280 }
 0x1a2   :  { %293 = vst.msk [vmem:[%s3243_s5] sm:$0xff] %vm292_vm0, %v281_v63 }
 0x1a9   :  { %v285_v4 = vpop.permute.xlu2 %284 }
 0x1aa   :  { %295 = vst.msk [vmem:[%s3243_s5 + $0x10] sm:$0xff] %vm292_vm0, %v285_v4 }
 0x1b1   :  { %v283_v12 = vpop.permute.xlu1 %282  ;;  %v336_v13 = vpop.permute.xlu2 %335 }
 0x1b2   :  { %294 = vst.msk [vmem:[%s3243_s5 + $0x8] sm:$0xff] %vm292_vm0, %v283_v12  ;;  %v353_v39 = vmul.f32 %v2405_v25, %v336_v13 }
 0x1b4   :  { %v357_v52 = vadd.f32 %v2410_v26, %v353_v39 }
 0x1b9   :  { %v346_v15 = vpop.permute.xlu2 %345 }
 0x1ba   :  { %v341_v16 = vpop.permute.xlu1 %340  ;;  %v355_v38 = vmul.f32 %v2405_v25, %v346_v15 }
 0x1bb   :  { %v354_v15 = vmul.f32 %v2405_v25, %v341_v16 }
 0x1bc   :  { %v359_v47 = vadd.f32 %v2410_v26, %v355_v38 }
 0x1bd   :  { %v358_v16 = vadd.f32 %v2410_v26, %v354_v15 }
 0x1c2   :  { %v367_v19 = vpop.permute.xlu2 %366 }
 0x1c3   :  { %v363_v20 = vpop.permute.xlu1 %362  ;;  %v378_v38 = vmul.f32 %v2416_v29, %v367_v19 }
 0x1c4   :  { %v377_v18 = vmul.f32 %v2416_v29, %v363_v20 }
 0x1c6   :  { %v381_v63 = vadd.f32 %v377_v18, %v357_v52 }
 0x1ca   :  { %v375_v22 = vpop.permute.xlu2 %374 }
 0x1cb   :  { %v371_v27 = vpop.permute.xlu1 %370  ;;  %v380_v49 = vmul.f32 %v2416_v29, %v375_v22  ;;  %v480_v22 = vmul.f32 %v2432_v41, %v2520_v35  ;;  %v481_v35 = vmul.f32 %v2432_v41, %v2538_v50 }
 0x1cc   :  { %v379_v8 = vmul.f32 %v2416_v29, %v371_v27 }
 0x1ce   :  { %v383_v11 = vadd.f32 %v379_v8, %v359_v47  ;;  %v478_v47 = vmul.f32 %v2432_v41, %v2484_v37 }
 0x1d3   :  { %v395_v30 = vpop.permute.xlu2 %394  ;;  %v287_v31 = vpop.permute.xlu0 %286 }
 0x1d4   :  { %296 = vst.msk [vmem:[%s3243_s5 + $0x18] sm:$0xff] %vm292_vm0, %v287_v31  ;;  %v391_v21 = vpop.permute.xlu1 %390  ;;  %v403_v48 = vmul.f32 %v2422_v33, %v395_v30 }
 0x1d6   :  { %v407_v4 = vadd.f32 %v403_v48, %v383_v11  ;;  %v479_v11 = vmul.f32 %v2432_v41, %v2400_v23 }
 0x1dc   :  { %v399_v32 = vpop.permute.xlu1 %398  ;;  %v411_v34 = vpop.permute.xlu2 %410 }
 0x1dd   :  { %v351_v36 = vpop.permute.xlu0 %350  ;;  %v404_v20 = vmul.f32 %v2422_v33, %v399_v32  ;;  %v425_v30 = vmul.f32 %v2437_v42, %v411_v34  ;;  %v402_v32 = vmul.f32 %v2422_v33, %v391_v21  ;;  %v382_v34 = vadd.f32 %v378_v38, %v358_v16 }
 0x1de   :  { %v356_v40 = vmul.f32 %v2405_v25, %v351_v36 }
 0x1df   :  { %v406_v18 = vadd.f32 %v402_v32, %v382_v34 }
 0x1e0   :  { %v360_v5 = vadd.f32 %v2410_v26, %v356_v40 }
 0x1e2   :  { %v384_v43 = vadd.f32 %v380_v49, %v360_v5 }
 0x1e4   :  { %v423_v53 = vpop.permute.xlu2 %422  ;;  %v408_v40 = vadd.f32 %v404_v20, %v384_v43 }
 0x1e5   :  { %v419_v54 = vpop.permute.xlu1 %418  ;;  %v387_v51 = vpop.permute.xlu0 %386  ;;  %v428_v27 = vmul.f32 %v2437_v42, %v423_v53 }
 0x1e6   :  { %v427_v12 = vmul.f32 %v2437_v42, %v419_v54  ;;  %v401_v13 = vmul.f32 %v2422_v33, %v387_v51 }
 0x1e7   :  { %v432_v5 = vadd.f32 %v428_v27, %v408_v40 }
 0x1e8   :  { %v431_v31 = vadd.f32 %v427_v12, %v407_v4  ;;  %v405_v36 = vadd.f32 %v401_v13, %v381_v63 }
 0x1e9   :  { %v485_v48 = vadd.f32 %v481_v35, %v432_v5 }
 0x1ea   :  { %v484_v39 = vadd.f32 %v480_v22, %v431_v31  ;;  %441 = vrot.lane.b32.xlu0 %v431_v31, %s2299_s29  ;;  %v429_v8 = vadd.f32 %v425_v30, %v405_v36 }
 0x1ec   :  { %2198 = vtanh.f32 %v484_v39  ;;  %437 = vrot.lane.b32.xlu1 %v429_v8, %s2299_s29  ;;  %v482_v52 = vadd.f32 %v478_v47, %v429_v8 }
 0x1ed   :  { %2200 = vtanh.f32 %v485_v48 }
 0x1ee   :  { %v415_v19 = vpop.permute.xlu0 %414  ;;  %2202 = vtanh.f32 %v482_v52 }
 0x1ef   :  { %v426_v49 = vmul.f32 %v2437_v42, %v415_v19 }
 0x1f1   :  { %v430_v21 = vadd.f32 %v426_v49, %v406_v18 }
 0x1f2   :  { %v2199_v53 = vpop.eup %2198 }
 0x1f3   :  { %v483_v43 = vadd.f32 %v479_v11, %v430_v21  ;;  %502 = vperm.xlu0 %2052, %v2199_v53   ;;  %439 = vrot.lane.b32.xlu2 %v430_v21, %s2299_s29  ;;  %v2201_v50 = vpop.eup %2200 }
 0x1f4   :  { %443 = vrot.lane.b32.xlu1 %v432_v5, %s2299_s29  ;;  %v2203_v37 = vpop.eup %2202 }
 0x1f5   :  { %2204 = vtanh.f32 %v483_v43 }
 0x1fb   :  { %v2205_v54 = vpop.eup %2204  ;;  %2055 = vset.pattern.permute.xlu0 %v2290_v0 }
 0x1fc   :  { %531 = vperm.xlu0 %2055, %v2201_v50   ;;  %492 = vperm.xlu1 %2050, %v2203_v37  }
 0x1fd   :  { %497 = vperm.xlu2 %2051, %v2205_v54  }
 0x204   :  { %2058 = vset.pattern.permute.xlu0 %v2293_v9  ;;  %507 = vperm.xlu1 %2050, %v2201_v50  }
 0x205   :  { %2053 = vset.pattern.permute.xlu2 %v2290_v0  ;;  %567 = vperm.xlu0 %2058, %v2203_v37  }
 0x206   :  { %519 = vperm.xlu2 %2053, %v2203_v37  }
 0x20c   :  { %2054 = vset.pattern.permute.xlu1 %v2290_v0 }
 0x20d   :  { %523 = vperm.xlu1 %2054, %v2205_v54   ;;  %2063 = vset.pattern.permute.xlu0 %v2291_v1 }
 0x20e   :  { %527 = vperm.xlu2 %2053, %v2199_v53  }
 0x215   :  { %2056 = vset.pattern.permute.xlu1 %v2292_v7 }
 0x216   :  { %2057 = vset.pattern.permute.xlu2 %v2292_v7  ;;  %543 = vperm.xlu1 %2056, %v2203_v37  }
 0x217   :  { %547 = vperm.xlu2 %2057, %v2205_v54  }
 0x21e   :  { %551 = vperm.xlu1 %2056, %v2199_v53  }
 0x21f   :  { %555 = vperm.xlu2 %2057, %v2201_v50  }
 0x226   :  { %2059 = vset.pattern.permute.xlu1 %v2293_v9 }
 0x227   :  { %2060 = vset.pattern.permute.xlu2 %v2293_v9  ;;  %571 = vperm.xlu1 %2059, %v2205_v54  }
 0x228   :  { %575 = vperm.xlu2 %2060, %v2199_v53  }
 0x22f   :  { %579 = vperm.xlu1 %2059, %v2201_v50   ;;  %v635_v50 = vmul.f32 %v2432_v41, %v2573_v2  ;;  %v637_v2 = vmul.f32 %v2432_v41, %v2541_v55  ;;  %v636_v55 = vmul.f32 %v2432_v41, %v2528_v46 }
 0x230   :  { %2062 = vset.pattern.permute.xlu2 %v2291_v1 }
 0x237   :  { %2061 = vset.pattern.permute.xlu1 %v2291_v1 }
 0x24d   :  { %v440_v23 = vpop.permute.xlu2 %439 }
 0x24e   :  { %451 = vst.msk [vmem:[%s3243_s5 + $0x8] sm:$0xff] %vm449_vm1, %v440_v23 }
 0x257   :  { %v498_v63 = vpop.permute.xlu2 %497 }
 0x258   :  { %v511_v52 = vmul.f32 %v2405_v25, %v498_v63 }
 0x25c   :  { %v442_v51 = vpop.permute.xlu0 %441 }
 0x25d   :  { %452 = vst.msk [vmem:[%s3243_s5 + $0x10] sm:$0xff] %vm449_vm1, %v442_v51  ;;  %v515_v51 = vadd.f32 %v2410_v26, %v511_v52 }
 0x25e   :  { %v438_v4 = vpop.permute.xlu1 %437 }
 0x25f   :  { %450 = vst.msk [vmem:[%s3243_s5] sm:$0xff] %vm449_vm1, %v438_v4 }
 0x260   :  { %v520_v13 = vpop.permute.xlu2 %519 }
 0x261   :  { %v534_v8 = vmul.f32 %v2416_v29, %v520_v13 }
 0x265   :  { %v503_v27 = vpop.permute.xlu0 %502 }
 0x266   :  { %v444_v12 = vpop.permute.xlu1 %443  ;;  %v512_v5 = vmul.f32 %v2405_v25, %v503_v27 }
 0x267   :  { %453 = vst.msk [vmem:[%s3243_s5 + $0x18] sm:$0xff] %vm449_vm1, %v444_v12 }
 0x268   :  { %v528_v20 = vpop.permute.xlu2 %527  ;;  %v516_v18 = vadd.f32 %v2410_v26, %v512_v5 }
 0x269   :  { %v536_v48 = vmul.f32 %v2416_v29, %v528_v20 }
 0x26b   :  { %v540_v53 = vadd.f32 %v536_v48, %v516_v18 }
 0x26e   :  { %v493_v15 = vpop.permute.xlu1 %492  ;;  %v532_v31 = vpop.permute.xlu0 %531 }
 0x26f   :  { %v510_v38 = vmul.f32 %v2405_v25, %v493_v15 }
 0x271   :  { %v548_v30 = vpop.permute.xlu2 %547  ;;  %v514_v40 = vadd.f32 %v2410_v26, %v510_v38 }
 0x272   :  { %v559_v15 = vmul.f32 %v2422_v33, %v548_v30 }
 0x273   :  { %v538_v35 = vadd.f32 %v534_v8, %v514_v40  ;;  %v537_v8 = vmul.f32 %v2416_v29, %v532_v31  ;;  %v638_v31 = vmul.f32 %v2432_v41, %v2581_v6 }
 0x276   :  { %v508_v22 = vpop.permute.xlu1 %507 }
 0x277   :  { %v568_v16 = vpop.permute.xlu0 %567  ;;  %v513_v13 = vmul.f32 %v2405_v25, %v508_v22 }
 0x278   :  { %v582_v47 = vmul.f32 %v2437_v42, %v568_v16 }
 0x279   :  { %v556_v39 = vpop.permute.xlu2 %555  ;;  %v517_v27 = vadd.f32 %v2410_v26, %v513_v13 }
 0x27a   :  { %v561_v30 = vmul.f32 %v2422_v33, %v556_v39 }
 0x27f   :  { %v524_v36 = vpop.permute.xlu1 %523 }
 0x280   :  { %v535_v37 = vmul.f32 %v2416_v29, %v524_v36 }
 0x282   :  { %v576_v11 = vpop.permute.xlu2 %575  ;;  %v539_v63 = vadd.f32 %v535_v37, %v515_v51 }
 0x283   :  { %v584_v54 = vmul.f32 %v2437_v42, %v576_v11 }
 0x284   :  { %v563_v36 = vadd.f32 %v559_v15, %v539_v63 }
 0x288   :  { %v544_v32 = vpop.permute.xlu1 %543 }
 0x289   :  { %v558_v34 = vmul.f32 %v2422_v33, %v544_v32  ;;  %v541_v32 = vadd.f32 %v537_v8, %v517_v27 }
 0x28b   :  { %v562_v19 = vadd.f32 %v558_v34, %v538_v35  ;;  %v565_v35 = vadd.f32 %v561_v30, %v541_v32 }
 0x28d   :  { %v586_v49 = vadd.f32 %v582_v47, %v562_v19 }
 0x28f   :  { %594 = vrot.lane.b32.xlu2 %v586_v49, %s2300_s12  ;;  %v639_v4 = vadd.f32 %v635_v50, %v586_v49 }
 0x290   :  { %v552_v21 = vpop.permute.xlu1 %551 }
 0x291   :  { %v560_v43 = vmul.f32 %v2422_v33, %v552_v21  ;;  %2206 = vtanh.f32 %v639_v4 }
 0x293   :  { %v564_v23 = vadd.f32 %v560_v43, %v540_v53 }
 0x295   :  { %v588_v12 = vadd.f32 %v584_v54, %v564_v23 }
 0x297   :  { %598 = vrot.lane.b32.xlu1 %v588_v12, %s2300_s12  ;;  %v641_v40 = vadd.f32 %v637_v2, %v588_v12  ;;  %v2207_v22 = vpop.eup %2206 }
 0x299   :  { %v572_v20 = vpop.permute.xlu1 %571  ;;  %2208 = vtanh.f32 %v641_v40 }
 0x29a   :  { %v583_v38 = vmul.f32 %v2437_v42, %v572_v20 }
 0x29c   :  { %v587_v16 = vadd.f32 %v583_v38, %v563_v36 }
 0x29e   :  { %596 = vrot.lane.b32.xlu0 %v587_v16, %s2300_s12  ;;  %v640_v47 = vadd.f32 %v636_v55, %v587_v16 }
 0x29f   :  { %649 = vperm.xlu1 %2061, %v2207_v22   ;;  %v2209_v18 = vpop.eup %2208 }
 0x2a0   :  { %2210 = vtanh.f32 %v640_v47 }
 0x2a1   :  { %v580_v5 = vpop.permute.xlu1 %579 }
 0x2a2   :  { %v585_v34 = vmul.f32 %v2437_v42, %v580_v5 }
 0x2a4   :  { %v589_v19 = vadd.f32 %v585_v34, %v565_v35 }
 0x2a6   :  { %v642_v48 = vadd.f32 %v638_v31, %v589_v19  ;;  %659 = vperm.xlu0 %2063, %v2209_v18   ;;  %600 = vrot.lane.b32.xlu2 %v589_v19, %s2300_s12  ;;  %v2211_v39 = vpop.eup %2210  ;;  %s2303_s12 = smov 2  }
 0x2a8   :  { %2212 = vtanh.f32 %v642_v48  ;;  %v794_v48 = vmul.f32 %v2432_v41, %v2548_v10  ;;  %v792_v10 = vmul.f32 %v2432_v41, %v2587_v14 }
 0x2ae   :  { %v2213_v49 = vpop.eup %2212  ;;  %2066 = vset.pattern.permute.xlu0 %v2290_v0  ;;  %654 = vperm.xlu2 %2062, %v2211_v39  }
 0x2af   :  { %688 = vperm.xlu0 %2066, %v2213_v49   ;;  %664 = vperm.xlu1 %2061, %v2213_v49  }
 0x2b6   :  { %2064 = vset.pattern.permute.xlu2 %v2290_v0 }
 0x2b7   :  { %2069 = vset.pattern.permute.xlu0 %v2293_v9  ;;  %676 = vperm.xlu2 %2064, %v2207_v22  }
 0x2b8   :  { %2065 = vset.pattern.permute.xlu1 %v2290_v0  ;;  %724 = vperm.xlu0 %2069, %v2207_v22  }
 0x2b9   :  { %680 = vperm.xlu1 %2065, %v2211_v39  }
 0x2bf   :  { %684 = vperm.xlu2 %2064, %v2209_v18  }
 0x2c0   :  { %2073 = vset.pattern.permute.xlu0 %v2291_v1 }
 0x2c1   :  { %2067 = vset.pattern.permute.xlu1 %v2292_v7 }
 0x2c2   :  { %700 = vperm.xlu1 %2067, %v2207_v22  }
 0x2c7   :  { %2068 = vset.pattern.permute.xlu2 %v2292_v7 }
 0x2c8   :  { %704 = vperm.xlu2 %2068, %v2211_v39  }
 0x2ca   :  { %708 = vperm.xlu1 %2067, %v2209_v18  }
 0x2d0   :  { %712 = vperm.xlu2 %2068, %v2213_v49  }
 0x2d2   :  { %2070 = vset.pattern.permute.xlu1 %v2293_v9 }
 0x2d3   :  { %728 = vperm.xlu1 %2070, %v2211_v39  }
 0x2d8   :  { %2071 = vset.pattern.permute.xlu2 %v2293_v9 }
 0x2d9   :  { %732 = vperm.xlu2 %2071, %v2209_v18  }
 0x2db   :  { %736 = vperm.xlu1 %2070, %v2213_v49  }
 0x2e1   :  { %2072 = vset.pattern.permute.xlu2 %v2291_v1 }
 0x2e3   :  { %2074 = vset.pattern.permute.xlu1 %v2291_v1 }
 0x2e9   :  { %v595_v46 = vpop.permute.xlu2 %594 }
 0x2ea   :  { %607 = vst.msk [vmem:[%s3243_s5] sm:$0xff] %vm606_vm2, %v595_v46 }
 0x300   :  { %v601_v6 = vpop.permute.xlu2 %600 }
 0x301   :  { %610 = vst.msk [vmem:[%s3243_s5 + $0x18] sm:$0xff] %vm606_vm2, %v601_v6 }
 0x308   :  { %v655_v11 = vpop.permute.xlu2 %654 }
 0x309   :  { %v599_v52 = vpop.permute.xlu1 %598  ;;  %v668_v30 = vmul.f32 %v2405_v25, %v655_v11 }
 0x30a   :  { %609 = vst.msk [vmem:[%s3243_s5 + $0x10] sm:$0xff] %vm606_vm2, %v599_v52 }
 0x30b   :  { %v672_v18 = vadd.f32 %v2410_v26, %v668_v30 }
 0x310   :  { %v597_v21 = vpop.permute.xlu0 %596 }
 0x311   :  { %608 = vst.msk [vmem:[%s3243_s5 + $0x8] sm:$0xff] %vm606_vm2, %v597_v21  ;;  %v677_v53 = vpop.permute.xlu2 %676  ;;  %v650_v43 = vpop.permute.xlu1 %649 }
 0x312   :  { %v667_v12 = vmul.f32 %v2405_v25, %v650_v43  ;;  %v691_v15 = vmul.f32 %v2416_v29, %v677_v53  ;;  %v2730_v53 = vld [vmem:[%s3240_s4] ss:$0 sm:$0xff] }
 0x314   :  { %v671_v13 = vadd.f32 %v2410_v26, %v667_v12 }
 0x316   :  { %v695_v36 = vadd.f32 %v691_v15, %v671_v13  ;;  %v2745_v15 = vld [vmem:[%s3241_s2] ss:$0 sm:$0xff] }
 0x318   :  { %v660_v37 = vpop.permute.xlu0 %659 }
 0x319   :  { %v685_v50 = vpop.permute.xlu2 %684  ;;  %v669_v27 = vmul.f32 %v2405_v25, %v660_v37 }
 0x31a   :  { %v693_v22 = vmul.f32 %v2416_v29, %v685_v50  ;;  %v2736_v50 = vld [vmem:[%s3239_s3 + $0x1] ss:$0 sm:$0xff] }
 0x31b   :  { %v673_v16 = vadd.f32 %v2410_v26, %v669_v27  ;;  %v793_v26 = vmul.f32 %v2432_v41, %v2545_v44 }
 0x31d   :  { %v697_v35 = vadd.f32 %v693_v22, %v673_v16 }
 0x321   :  { %v665_v54 = vpop.permute.xlu1 %664  ;;  %v689_v51 = vpop.permute.xlu0 %688 }
 0x322   :  { %v705_v23 = vpop.permute.xlu2 %704  ;;  %v670_v6 = vmul.f32 %v2405_v25, %v665_v54  ;;  %v694_v37 = vmul.f32 %v2736_v50, %v689_v51 }
 0x323   :  { %v716_v52 = vmul.f32 %v2422_v33, %v705_v23 }
 0x324   :  { %v674_v25 = vadd.f32 %v2730_v53, %v670_v6 }
 0x326   :  { %v698_v14 = vadd.f32 %v694_v37, %v674_v25 }
 0x32a   :  { %v713_v63 = vpop.permute.xlu2 %712  ;;  %v725_v2 = vpop.permute.xlu0 %724 }
 0x32b   :  { %v681_v4 = vpop.permute.xlu1 %680  ;;  %v739_v40 = vmul.f32 %v2437_v42, %v725_v2  ;;  %v718_v44 = vmul.f32 %v2422_v33, %v713_v63 }
 0x32c   :  { %v692_v47 = vmul.f32 %v2416_v29, %v681_v4 }
 0x32d   :  { %v722_v12 = vadd.f32 %v718_v44, %v698_v14  ;;  %v934_v44 = vmul.f32 %v2745_v15, %v2558_v58 }
 0x32e   :  { %v696_v49 = vadd.f32 %v692_v47, %v672_v18 }
 0x330   :  { %v720_v29 = vadd.f32 %v716_v52, %v696_v49 }
 0x333   :  { %v733_v55 = vpop.permute.xlu2 %732 }
 0x334   :  { %v701_v20 = vpop.permute.xlu1 %700  ;;  %v741_v31 = vmul.f32 %v2437_v42, %v733_v55 }
 0x335   :  { %v715_v38 = vmul.f32 %v2422_v33, %v701_v20 }
 0x337   :  { %v719_v8 = vadd.f32 %v715_v38, %v695_v36 }
 0x339   :  { %v743_v32 = vadd.f32 %v739_v40, %v719_v8 }
 0x33b   :  { %751 = vrot.lane.b32.xlu2 %v743_v32, %s2301_s21  ;;  %v796_v54 = vadd.f32 %v792_v10, %v743_v32 }
 0x33c   :  { %v709_v5 = vpop.permute.xlu1 %708 }
 0x33d   :  { %v717_v34 = vmul.f32 %v2422_v33, %v709_v5  ;;  %v795_v33 = vmul.f32 %v2745_v15, %v2552_v56 }
 0x33f   :  { %v721_v19 = vadd.f32 %v717_v34, %v697_v35  ;;  %v2776_v35 = vld [vmem:[%s3239_s3] ss:$0 sm:$0xff] }
 0x341   :  { %v745_v39 = vadd.f32 %v741_v31, %v721_v19 }
 0x343   :  { %755 = vrot.lane.b32.xlu1 %v745_v39, %s2301_s21  ;;  %v798_v46 = vadd.f32 %v794_v48, %v745_v39 }
 0x345   :  { %2214 = vtanh.f32 %v798_v46  ;;  %v729_v11 = vpop.permute.xlu1 %728  ;;  %v2786_v46 = vld [vmem:[%s3239_s3 + $0x2] ss:$0 sm:$0xff] }
 0x346   :  { %v740_v21 = vmul.f32 %v2437_v42, %v729_v11 }
 0x348   :  { %v744_v43 = vadd.f32 %v740_v21, %v720_v29 }
 0x34a   :  { %v797_v23 = vadd.f32 %v793_v26, %v744_v43  ;;  %753 = vrot.lane.b32.xlu0 %v744_v43, %s2301_s21  ;;  %v2795_v43 = vld [vmem:[%s3239_s3 + $0x3] ss:$0 sm:$0xff] }
 0x34b   :  { %v2215_v41 = vpop.eup %2214 }
 0x34c   :  { %2216 = vtanh.f32 %v797_v23  ;;  %816 = vperm.xlu1 %2074, %v2215_v41  }
 0x34d   :  { %v737_v4 = vpop.permute.xlu1 %736  ;;  %2218 = vtanh.f32 %v796_v54 }
 0x34e   :  { %v742_v13 = vmul.f32 %v2437_v42, %v737_v4 }
 0x350   :  { %v746_v51 = vadd.f32 %v742_v13, %v722_v12 }
 0x352   :  { %v2217_v63 = vpop.eup %2216  ;;  %v799_v2 = vadd.f32 %v795_v33, %v746_v51  ;;  %757 = vrot.lane.b32.xlu2 %v746_v51, %s2301_s21  ;;  %v933_v33 = vmul.f32 %v2745_v15, %v2589_v17  ;;  %s2304_s21 = smov 3  }
 0x353   :  { %811 = vperm.xlu0 %2073, %v2217_v63   ;;  %v2219_v20 = vpop.eup %2218 }
 0x354   :  { %2075 = vset.pattern.permute.xlu1 %v2290_v0  ;;  %2220 = vtanh.f32 %v799_v2 }
 0x355   :  { %833 = vperm.xlu1 %2075, %v2219_v20  }
 0x35a   :  { %806 = vperm.xlu2 %2072, %v2219_v20   ;;  %v2221_v42 = vpop.eup %2220 }
 0x35b   :  { %2077 = vset.pattern.permute.xlu0 %v2290_v0 }
 0x35c   :  { %841 = vperm.xlu0 %2077, %v2215_v41  }
 0x35d   :  { %845 = vperm.xlu1 %2075, %v2221_v42  }
 0x362   :  { %821 = vperm.xlu2 %2072, %v2221_v42  }
 0x364   :  { %2080 = vset.pattern.permute.xlu0 %v2292_v7 }
 0x365   :  { %869 = vperm.xlu0 %2080, %v2221_v42   ;;  %2079 = vset.pattern.permute.xlu1 %v2292_v7 }
 0x366   :  { %861 = vperm.xlu1 %2079, %v2217_v63  }
 0x36a   :  { %2076 = vset.pattern.permute.xlu2 %v2290_v0 }
 0x36b   :  { %837 = vperm.xlu2 %2076, %v2217_v63  }
 0x36d   :  { %2084 = vset.pattern.permute.xlu0 %v2291_v1 }
 0x36e   :  { %2081 = vset.pattern.permute.xlu1 %v2293_v9 }
 0x36f   :  { %881 = vperm.xlu1 %2081, %v2219_v20  }
 0x373   :  { %2078 = vset.pattern.permute.xlu2 %v2292_v7 }
 0x374   :  { %857 = vperm.xlu2 %2078, %v2219_v20  }
 0x377   :  { %889 = vperm.xlu1 %2081, %v2215_v41  }
 0x37c   :  { %865 = vperm.xlu2 %2078, %v2215_v41  }
 0x37f   :  { %2085 = vset.pattern.permute.xlu1 %v2291_v1 }
 0x384   :  { %2082 = vset.pattern.permute.xlu2 %v2293_v9 }
 0x385   :  { %885 = vperm.xlu2 %2082, %v2217_v63  }
 0x38d   :  { %893 = vperm.xlu2 %2082, %v2221_v42  }
 0x395   :  { %v752_v56 = vpop.permute.xlu2 %751  ;;  %2083 = vset.pattern.permute.xlu2 %v2291_v1 }
 0x396   :  { %764 = vst.msk [vmem:[%s3243_s5] sm:$0xff] %vm763_vm3, %v752_v56 }
 0x3ac   :  { %v758_v27 = vpop.permute.xlu2 %757 }
 0x3ad   :  { %767 = vst.msk [vmem:[%s3243_s5 + $0x18] sm:$0xff] %vm763_vm3, %v758_v27 }
 0x3b4   :  { %v807_v36 = vpop.permute.xlu2 %806 }
 0x3b5   :  { %v756_v38 = vpop.permute.xlu1 %755  ;;  %v824_v18 = vmul.f32 %v2776_v35, %v807_v36 }
 0x3b6   :  { %766 = vst.msk [vmem:[%s3243_s5 + $0x10] sm:$0xff] %vm763_vm3, %v756_v38 }
 0x3b7   :  { %v828_v52 = vadd.f32 %v2730_v53, %v824_v18 }
 0x3bc   :  { %v822_v40 = vpop.permute.xlu2 %821  ;;  %v754_v8 = vpop.permute.xlu0 %753 }
 0x3bd   :  { %765 = vst.msk [vmem:[%s3243_s5 + $0x8] sm:$0xff] %vm763_vm3, %v754_v8  ;;  %v827_v21 = vmul.f32 %v2776_v35, %v822_v40 }
 0x3be   :  { %v817_v16 = vpop.permute.xlu1 %816 }
 0x3bf   :  { %v826_v54 = vmul.f32 %v2776_v35, %v817_v16  ;;  %v831_v51 = vadd.f32 %v2730_v53, %v827_v21 }
 0x3c1   :  { %v830_v42 = vadd.f32 %v2730_v53, %v826_v54 }
 0x3c5   :  { %v838_v22 = vpop.permute.xlu2 %837  ;;  %v812_v30 = vpop.permute.xlu0 %811 }
 0x3c6   :  { %v825_v34 = vmul.f32 %v2776_v35, %v812_v30  ;;  %v849_v39 = vmul.f32 %v2736_v50, %v838_v22 }
 0x3c7   :  { %v834_v32 = vpop.permute.xlu1 %833 }
 0x3c8   :  { %v829_v48 = vadd.f32 %v2730_v53, %v825_v34  ;;  %v848_v49 = vmul.f32 %v2736_v50, %v834_v32  ;;  %v935_v34 = vmul.f32 %v2745_v15, %v2555_v57 }
 0x3ca   :  { %v853_v11 = vadd.f32 %v849_v39, %v829_v48  ;;  %v852_v10 = vadd.f32 %v848_v49, %v828_v52 }
 0x3ce   :  { %v858_v55 = vpop.permute.xlu2 %857  ;;  %v842_v31 = vpop.permute.xlu0 %841 }
 0x3cf   :  { %v846_v5 = vpop.permute.xlu1 %845  ;;  %v872_v29 = vmul.f32 %v2786_v46, %v858_v55  ;;  %v850_v63 = vmul.f32 %v2736_v50, %v842_v31  ;;  %v936_v55 = vmul.f32 %v2745_v15, %v2563_v60 }
 0x3d0   :  { %v851_v4 = vmul.f32 %v2736_v50, %v846_v5 }
 0x3d1   :  { %v876_v14 = vadd.f32 %v872_v29, %v852_v10  ;;  %v854_v38 = vadd.f32 %v850_v63, %v830_v42 }
 0x3d2   :  { %v855_v56 = vadd.f32 %v851_v4, %v831_v51 }
 0x3d6   :  { %v866_v47 = vpop.permute.xlu2 %865 }
 0x3d7   :  { %v870_v23 = vpop.permute.xlu0 %869  ;;  %v874_v27 = vmul.f32 %v2786_v46, %v866_v47 }
 0x3d8   :  { %v862_v19 = vpop.permute.xlu1 %861  ;;  %v875_v58 = vmul.f32 %v2786_v46, %v870_v23 }
 0x3d9   :  { %v873_v6 = vmul.f32 %v2786_v46, %v862_v19  ;;  %v878_v22 = vadd.f32 %v874_v27, %v854_v38 }
 0x3da   :  { %v879_v40 = vadd.f32 %v875_v58, %v855_v56 }
 0x3db   :  { %v877_v25 = vadd.f32 %v873_v6, %v853_v11 }
 0x3df   :  { %v886_v26 = vpop.permute.xlu2 %885 }
 0x3e0   :  { %v897_v37 = vmul.f32 %v2795_v43, %v886_v26 }
 0x3e1   :  { %v882_v41 = vpop.permute.xlu1 %881 }
 0x3e2   :  { %v901_v12 = vadd.f32 %v897_v37, %v877_v25  ;;  %v896_v13 = vmul.f32 %v2795_v43, %v882_v41 }
 0x3e4   :  { %v938_v2 = vadd.f32 %v934_v44, %v901_v12  ;;  %v900_v20 = vadd.f32 %v896_v13, %v876_v14  ;;  %906 = vst.msk [vmem:[%s3243_s5 + $0x8] sm:$0xff] %vm904_vm4, %v901_v12 }
 0x3e6   :  { %2222 = vtanh.f32 %v938_v2  ;;  %v937_v17 = vadd.f32 %v933_v33, %v900_v20  ;;  %905 = vst.msk [vmem:[%s3243_s5] sm:$0xff] %vm904_vm4, %v900_v20  ;;  %v1091_v2 = vmul.f32 %v2745_v15, %v2560_v59 }
 0x3e7   :  { %v894_v36 = vpop.permute.xlu2 %893 }
 0x3e8   :  { %2224 = vtanh.f32 %v937_v17  ;;  %v899_v8 = vmul.f32 %v2795_v43, %v894_v36 }
 0x3e9   :  { %v890_v16 = vpop.permute.xlu1 %889 }
 0x3ea   :  { %v903_v32 = vadd.f32 %v899_v8, %v879_v40  ;;  %v898_v30 = vmul.f32 %v2795_v43, %v890_v16 }
 0x3ec   :  { %v2223_v5 = vpop.eup %2222  ;;  %v902_v47 = vadd.f32 %v898_v30, %v878_v22  ;;  %908 = vst.msk [vmem:[%s3243_s5 + $0x18] sm:$0xff] %vm904_vm4, %v903_v32  ;;  %v940_v31 = vadd.f32 %v936_v55, %v903_v32 }
 0x3ed   :  { %952 = vperm.xlu0 %2084, %v2223_v5  }
 0x3ee   :  { %v2225_v19 = vpop.eup %2224  ;;  %v939_v18 = vadd.f32 %v935_v34, %v902_v47  ;;  %907 = vst.msk [vmem:[%s3243_s5 + $0x10] sm:$0xff] %vm904_vm4, %v902_v47 }
 0x3ef   :  { %947 = vperm.xlu2 %2083, %v2225_v19  }
 0x3f0   :  { %2226 = vtanh.f32 %v939_v18 }
 0x3f1   :  { %2228 = vtanh.f32 %v940_v31 }
 0x3f5   :  { %2088 = vset.pattern.permute.xlu0 %v2290_v0 }
 0x3f6   :  { %v2227_v57 = vpop.eup %2226 }
 0x3f7   :  { %v2229_v60 = vpop.eup %2228  ;;  %982 = vperm.xlu0 %2088, %v2227_v57   ;;  %957 = vperm.xlu1 %2085, %v2227_v57  }
 0x3f8   :  { %962 = vperm.xlu2 %2083, %v2229_v60  }
 0x3ff   :  { %2091 = vset.pattern.permute.xlu0 %v2292_v7  ;;  %2086 = vset.pattern.permute.xlu1 %v2290_v0 }
 0x400   :  { %2087 = vset.pattern.permute.xlu2 %v2290_v0  ;;  %974 = vperm.xlu1 %2086, %v2225_v19  }
 0x401   :  { %1010 = vperm.xlu0 %2091, %v2229_v60   ;;  %978 = vperm.xlu2 %2087, %v2223_v5  }
 0x408   :  { %986 = vperm.xlu1 %2086, %v2229_v60  }
 0x409   :  { %2089 = vset.pattern.permute.xlu2 %v2292_v7  ;;  %2096 = vset.pattern.permute.xlu0 %v2291_v1 }
 0x40a   :  { %998 = vperm.xlu2 %2089, %v2225_v19  }
 0x410   :  { %2090 = vset.pattern.permute.xlu1 %v2292_v7 }
 0x411   :  { %1002 = vperm.xlu1 %2090, %v2223_v5  }
 0x412   :  { %1006 = vperm.xlu2 %2089, %v2227_v57  }
 0x419   :  { %2092 = vset.pattern.permute.xlu1 %v2293_v9 }
 0x41a   :  { %2093 = vset.pattern.permute.xlu2 %v2293_v9  ;;  %1022 = vperm.xlu1 %2092, %v2225_v19  }
 0x41b   :  { %1026 = vperm.xlu2 %2093, %v2223_v5   ;;  %v1090_v5 = vmul.f32 %v2745_v15, %v2567_v62 }
 0x422   :  { %1030 = vperm.xlu1 %2092, %v2227_v57  }
 0x423   :  { %1034 = vperm.xlu2 %2093, %v2229_v60  }
 0x42a   :  { %2095 = vset.pattern.permute.xlu1 %v2291_v1 }
 0x42b   :  { %2094 = vset.pattern.permute.xlu2 %v2291_v1 }
 0x449   :  { %v948_v48 = vpop.permute.xlu2 %947 }
 0x44a   :  { %v965_v54 = vmul.f32 %v2776_v35, %v948_v48 }
 0x44c   :  { %v969_v58 = vadd.f32 %v2730_v53, %v965_v54 }
 0x452   :  { %v963_v39 = vpop.permute.xlu2 %962 }
 0x453   :  { %v968_v14 = vmul.f32 %v2776_v35, %v963_v39  ;;  %v1093_v39 = vmul.f32 %v2745_v15, %v2575_v3 }
 0x455   :  { %v972_v20 = vadd.f32 %v2730_v53, %v968_v14 }
 0x45b   :  { %v979_v49 = vpop.permute.xlu2 %978 }
 0x45c   :  { %v990_v44 = vmul.f32 %v2736_v50, %v979_v49 }
 0x45f   :  { %v953_v29 = vpop.permute.xlu0 %952 }
 0x460   :  { %v966_v10 = vmul.f32 %v2776_v35, %v953_v29 }
 0x462   :  { %v970_v37 = vadd.f32 %v2730_v53, %v966_v10 }
 0x464   :  { %v999_v52 = vpop.permute.xlu2 %998  ;;  %v994_v4 = vadd.f32 %v990_v44, %v970_v37  ;;  %v1226_v37 = vld [vmem:[%s3242_s0 + $0x18] sm:$0xff] }
 0x465   :  { %v1013_v40 = vmul.f32 %v2786_v46, %v999_v52 }
 0x469   :  { %v958_v6 = vpop.permute.xlu1 %957  ;;  %v983_v25 = vpop.permute.xlu0 %982 }
 0x46a   :  { %v967_v56 = vmul.f32 %v2776_v35, %v958_v6  ;;  %v991_v34 = vmul.f32 %v2736_v50, %v983_v25  ;;  %v1225_v25 = vld [vmem:[%s3242_s0 + $0x10] sm:$0xff] }
 0x46c   :  { %v1007_v21 = vpop.permute.xlu2 %1006  ;;  %v971_v59 = vadd.f32 %v2730_v53, %v967_v56 }
 0x46d   :  { %v1015_v48 = vmul.f32 %v2786_v46, %v1007_v21 }
 0x46e   :  { %v995_v19 = vadd.f32 %v991_v34, %v971_v59 }
 0x470   :  { %v1019_v6 = vadd.f32 %v1015_v48, %v995_v19 }
 0x472   :  { %v975_v11 = vpop.permute.xlu1 %974 }
 0x473   :  { %v989_v13 = vmul.f32 %v2736_v50, %v975_v11  ;;  %v1011_v17 = vpop.permute.xlu0 %1010  ;;  %v1092_v11 = vmul.f32 %v2745_v15, %v2591_v24  ;;  %v1224_v24 = vld [vmem:[%s3242_s0 + $0x8] sm:$0xff] }
 0x474   :  { %v1016_v8 = vmul.f32 %v2786_v46, %v1011_v17 }
 0x475   :  { %v1027_v23 = vpop.permute.xlu2 %1026  ;;  %v993_v27 = vadd.f32 %v989_v13, %v969_v58 }
 0x476   :  { %v1038_v33 = vmul.f32 %v2795_v43, %v1027_v23 }
 0x477   :  { %v1017_v32 = vadd.f32 %v1013_v40, %v993_v27 }
 0x47a   :  { %v987_v26 = vpop.permute.xlu1 %986 }
 0x47b   :  { %v992_v51 = vmul.f32 %v2736_v50, %v987_v26 }
 0x47d   :  { %v996_v36 = vadd.f32 %v992_v51, %v972_v20  ;;  %v1035_v22 = vpop.permute.xlu2 %1034 }
 0x47e   :  { %v1040_v31 = vmul.f32 %v2795_v43, %v1035_v22 }
 0x47f   :  { %v1020_v55 = vadd.f32 %v1016_v8, %v996_v36 }
 0x481   :  { %v1044_v60 = vadd.f32 %v1040_v31, %v1020_v55 }
 0x483   :  { %v1003_v41 = vpop.permute.xlu1 %1002  ;;  %v1097_v52 = vadd.f32 %v1093_v39, %v1044_v60 }
 0x484   :  { %v1014_v12 = vmul.f32 %v2786_v46, %v1003_v41 }
 0x486   :  { %v1018_v63 = vadd.f32 %v1014_v12, %v994_v4 }
 0x488   :  { %v1042_v42 = vadd.f32 %v1038_v33, %v1018_v63 }
 0x48a   :  { %v1095_v38 = vadd.f32 %v1091_v2, %v1042_v42  ;;  %1051 = vrot.lane.b32.xlu1 %v1042_v42, %s2302_s24 }
 0x48c   :  { %2230 = vtanh.f32 %v1095_v38  ;;  %v1023_v16 = vpop.permute.xlu1 %1022 }
 0x48d   :  { %v1037_v30 = vmul.f32 %v2795_v43, %v1023_v16 }
 0x48f   :  { %v1041_v47 = vadd.f32 %v1037_v30, %v1017_v32 }
 0x491   :  { %v1094_v18 = vadd.f32 %v1090_v5, %v1041_v47  ;;  %1049 = vrot.lane.b32.xlu0 %v1041_v47, %s2302_s24 }
 0x492   :  { %v2231_v57 = vpop.eup %2230 }
 0x493   :  { %1109 = vperm.xlu1 %2095, %v2231_v57   ;;  %2232 = vtanh.f32 %v1094_v18 }
 0x494   :  { %v1031_v49 = vpop.permute.xlu1 %1030  ;;  %2234 = vtanh.f32 %v1097_v52 }
 0x495   :  { %v1039_v62 = vmul.f32 %v2795_v43, %v1031_v49  ;;  %v1247_v49 = vmul.f32 %v2745_v15, %v2565_v61 }
 0x497   :  { %v1043_v29 = vadd.f32 %v1039_v62, %v1019_v6 }
 0x499   :  { %v1096_v26 = vadd.f32 %v1092_v11, %v1043_v29  ;;  %1053 = vrot.lane.b32.xlu2 %v1043_v29, %s2302_s24  ;;  %1055 = vrot.lane.b32.xlu0 %v1044_v60, %s2302_s24  ;;  %v2233_v21 = vpop.eup %2232 }
 0x49a   :  { %v2235_v3 = vpop.eup %2234 }
 0x49b   :  { %2097 = vset.pattern.permute.xlu1 %v2290_v0  ;;  %2236 = vtanh.f32 %v1096_v26 }
 0x49c   :  { %1131 = vperm.xlu1 %2097, %v2233_v21  }
 0x4a1   :  { %1104 = vperm.xlu2 %2094, %v2233_v21   ;;  %1119 = vperm.xlu0 %2096, %v2235_v3   ;;  %v2237_v10 = vpop.eup %2236 }
 0x4a4   :  { %1139 = vperm.xlu1 %2097, %v2237_v10  }
 0x4a9   :  { %1114 = vperm.xlu2 %2094, %v2237_v10   ;;  %2099 = vset.pattern.permute.xlu0 %v2292_v7 }
 0x4aa   :  { %1155 = vperm.xlu0 %2099, %v2233_v21  }
 0x4ac   :  { %2100 = vset.pattern.permute.xlu1 %v2292_v7 }
 0x4ad   :  { %1159 = vperm.xlu1 %2100, %v2231_v57  }
 0x4b1   :  { %2098 = vset.pattern.permute.xlu2 %v2290_v0 }
 0x4b2   :  { %1135 = vperm.xlu2 %2098, %v2231_v57   ;;  %2103 = vset.pattern.permute.xlu0 %v2293_v9 }
 0x4b3   :  { %1183 = vperm.xlu0 %2103, %v2231_v57  }
 0x4b5   :  { %1167 = vperm.xlu1 %2100, %v2235_v3  }
 0x4ba   :  { %1143 = vperm.xlu2 %2098, %v2235_v3  }
 0x4bb   :  { %2104 = vset.pattern.permute.xlu0 %v2297_v45 }
 0x4bc   :  { %1234 = vperm.xlu0 %2104, %v1224_v24  }
 0x4bd   :  { %2105 = vset.pattern.permute.xlu1 %v2297_v45 }
 0x4be   :  { %1239 = vperm.xlu1 %2105, %v1225_v25  }
 0x4c2   :  { %2101 = vset.pattern.permute.xlu2 %v2292_v7 }
 0x4c3   :  { %1163 = vperm.xlu2 %2101, %v2237_v10  }
 0x4c4   :  { %2110 = vset.pattern.permute.xlu0 %v2291_v1 }
 0x4c6   :  { %2106 = vset.pattern.permute.xlu1 %v2293_v9 }
 0x4c7   :  { %1187 = vperm.xlu1 %2106, %v2237_v10  }
 0x4cb   :  { %2102 = vset.pattern.permute.xlu2 %v2293_v9 }
 0x4cc   :  { %1179 = vperm.xlu2 %2102, %v2233_v21  }
 0x4cf   :  { %2108 = vset.pattern.permute.xlu1 %v2291_v1 }
 0x4d4   :  { %1191 = vperm.xlu2 %2102, %v2235_v3  }
 0x4dc   :  { %2107 = vset.pattern.permute.xlu2 %v2297_v45 }
 0x4dd   :  { %1244 = vperm.xlu2 %2107, %v1226_v37  }
 0x4e5   :  { %2109 = vset.pattern.permute.xlu2 %v2291_v1 }
 0x4f3   :  { %v1054_v44 = vpop.permute.xlu2 %1053 }
 0x4f4   :  { %1064 = vst.msk [vmem:[%s3243_s5 + $0x10] sm:$0xff] %vm1061_vm5, %v1054_v44 }
 0x4fb   :  { %v1105_v54 = vpop.permute.xlu2 %1104 }
 0x4fc   :  { %v1052_v23 = vpop.permute.xlu1 %1051  ;;  %v1122_v42 = vmul.f32 %v2776_v35, %v1105_v54 }
 0x4fd   :  { %1063 = vst.msk [vmem:[%s3243_s5 + $0x8] sm:$0xff] %vm1061_vm5, %v1052_v23 }
 0x4fe   :  { %v1126_v40 = vadd.f32 %v2730_v53, %v1122_v42 }
 0x503   :  { %v1115_v41 = vpop.permute.xlu2 %1114  ;;  %v1050_v14 = vpop.permute.xlu0 %1049 }
 0x504   :  { %1062 = vst.msk [vmem:[%s3243_s5] sm:$0xff] %vm1061_vm5, %v1050_v14  ;;  %v1124_v24 = vmul.f32 %v2776_v35, %v1115_v41 }
 0x505   :  { %v1110_v45 = vpop.permute.xlu1 %1109 }
 0x506   :  { %v1123_v20 = vmul.f32 %v2776_v35, %v1110_v45  ;;  %v1128_v61 = vadd.f32 %v2730_v53, %v1124_v24 }
 0x508   :  { %v1127_v36 = vadd.f32 %v2730_v53, %v1123_v20 }
 0x50b   :  { %v1056_v4 = vpop.permute.xlu0 %1055 }
 0x50c   :  { %1065 = vst.msk [vmem:[%s3243_s5 + $0x18] sm:$0xff] %vm1061_vm5, %v1056_v4  ;;  %v1136_v12 = vpop.permute.xlu2 %1135 }
 0x50d   :  { %v1147_v27 = vmul.f32 %v2736_v50, %v1136_v12 }
 0x50e   :  { %v1132_v13 = vpop.permute.xlu1 %1131 }
 0x50f   :  { %v1146_v17 = vmul.f32 %v2736_v50, %v1132_v13  ;;  %v1151_v16 = vadd.f32 %v1147_v27, %v1127_v36 }
 0x511   :  { %v1150_v59 = vadd.f32 %v1146_v17, %v1126_v40 }
 0x513   :  { %v1120_v33 = vpop.permute.xlu0 %1119 }
 0x514   :  { %v1144_v51 = vpop.permute.xlu2 %1143  ;;  %v1125_v22 = vmul.f32 %v2776_v35, %v1120_v33 }
 0x515   :  { %v1149_v57 = vmul.f32 %v2736_v50, %v1144_v51 }
 0x516   :  { %v1140_v63 = vpop.permute.xlu1 %1139  ;;  %v1129_v18 = vadd.f32 %v2730_v53, %v1125_v22 }
 0x517   :  { %v1148_v25 = vmul.f32 %v2736_v50, %v1140_v63 }
 0x518   :  { %v1153_v39 = vadd.f32 %v1149_v57, %v1129_v18 }
 0x519   :  { %v1152_v54 = vadd.f32 %v1148_v25, %v1128_v61 }
 0x51c   :  { %v1156_v58 = vpop.permute.xlu0 %1155 }
 0x51d   :  { %v1164_v2 = vpop.permute.xlu2 %1163  ;;  %v1170_v8 = vmul.f32 %v2786_v46, %v1156_v58 }
 0x51e   :  { %v1172_v37 = vmul.f32 %v2786_v46, %v1164_v2 }
 0x51f   :  { %v1160_v56 = vpop.permute.xlu1 %1159  ;;  %v1174_v34 = vadd.f32 %v1170_v8, %v1150_v59 }
 0x520   :  { %v1171_v38 = vmul.f32 %v2786_v46, %v1160_v56  ;;  %v1176_v12 = vadd.f32 %v1172_v37, %v1152_v54 }
 0x522   :  { %v1175_v30 = vadd.f32 %v1171_v38, %v1151_v16 }
 0x525   :  { %v1184_v32 = vpop.permute.xlu0 %1183 }
 0x526   :  { %v1195_v55 = vmul.f32 %v2795_v43, %v1184_v32  ;;  %v1180_v5 = vpop.permute.xlu2 %1179 }
 0x527   :  { %v1194_v47 = vmul.f32 %v2795_v43, %v1180_v5  ;;  %v1168_v19 = vpop.permute.xlu1 %1167 }
 0x528   :  { %v1199_v31 = vadd.f32 %v1195_v55, %v1175_v30  ;;  %v1173_v48 = vmul.f32 %v2786_v46, %v1168_v19 }
 0x529   :  { %v1198_v60 = vadd.f32 %v1194_v47, %v1174_v34 }
 0x52a   :  { %1208 = vrot.lane.b32.xlu2 %v1199_v31, %s2303_s12  ;;  %v1177_v52 = vadd.f32 %v1173_v48, %v1153_v39 }
 0x52b   :  { %1206 = vrot.lane.b32.xlu1 %v1198_v60, %s2303_s12  ;;  %v1251_v26 = vadd.f32 %v1247_v49, %v1198_v60 }
 0x52e   :  { %v1192_v6 = vpop.permute.xlu2 %1191  ;;  %v1235_v62 = vpop.permute.xlu0 %1234 }
 0x52f   :  { %v1197_v11 = vmul.f32 %v2795_v43, %v1192_v6  ;;  %v1248_v29 = vmul.f32 %v2745_v15, %v1235_v62 }
 0x530   :  { %v1240_v21 = vpop.permute.xlu1 %1239 }
 0x531   :  { %v1201_v3 = vadd.f32 %v1197_v11, %v1177_v52  ;;  %v1252_v10 = vadd.f32 %v1248_v29, %v1199_v31  ;;  %v1249_v41 = vmul.f32 %v2745_v15, %v1240_v21 }
 0x533   :  { %2238 = vtanh.f32 %v1252_v10  ;;  %1212 = vrot.lane.b32.xlu1 %v1201_v3, %s2303_s12 }
 0x534   :  { %2240 = vtanh.f32 %v1251_v26 }
 0x537   :  { %v1245_v44 = vpop.permute.xlu2 %1244 }
 0x538   :  { %v1250_v23 = vmul.f32 %v2745_v15, %v1245_v44 }
 0x539   :  { %v2239_v14 = vpop.eup %2238  ;;  %v1188_v45 = vpop.permute.xlu1 %1187 }
 0x53a   :  { %v2241_v4 = vpop.eup %2240  ;;  %v1254_v13 = vadd.f32 %v1250_v23, %v1201_v3  ;;  %v1196_v33 = vmul.f32 %v2795_v43, %v1188_v45  ;;  %1266 = vperm.xlu2 %2109, %v2239_v14  }
 0x53b   :  { %1261 = vperm.xlu1 %2108, %v2241_v4  }
 0x53c   :  { %2242 = vtanh.f32 %v1254_v13  ;;  %v1200_v51 = vadd.f32 %v1196_v33, %v1176_v12 }
 0x53e   :  { %v1253_v63 = vadd.f32 %v1249_v41, %v1200_v51  ;;  %1210 = vrot.lane.b32.xlu0 %v1200_v51, %s2303_s12 }
 0x540   :  { %2244 = vtanh.f32 %v1253_v63 }
 0x542   :  { %v2243_v58 = vpop.eup %2242  ;;  %2111 = vset.pattern.permute.xlu2 %v2290_v0 }
 0x543   :  { %1276 = vperm.xlu1 %2108, %v2243_v58   ;;  %1288 = vperm.xlu2 %2111, %v2241_v4  }
 0x546   :  { %v2245_v2 = vpop.eup %2244 }
 0x547   :  { %1271 = vperm.xlu0 %2110, %v2245_v2  }
 0x54b   :  { %2112 = vset.pattern.permute.xlu1 %v2290_v0  ;;  %1296 = vperm.xlu2 %2111, %v2245_v2  }
 0x54c   :  { %1292 = vperm.xlu1 %2112, %v2239_v14  }
 0x54f   :  { %2113 = vset.pattern.permute.xlu0 %v2290_v0 }
 0x550   :  { %1300 = vperm.xlu0 %2113, %v2243_v58  }
 0x553   :  { %2115 = vset.pattern.permute.xlu2 %v2292_v7 }
 0x554   :  { %2114 = vset.pattern.permute.xlu1 %v2292_v7  ;;  %1316 = vperm.xlu2 %2115, %v2239_v14  }
 0x555   :  { %1312 = vperm.xlu1 %2114, %v2241_v4  }
 0x558   :  { %2116 = vset.pattern.permute.xlu0 %v2293_v9 }
 0x559   :  { %1336 = vperm.xlu0 %2116, %v2241_v4  }
 0x55c   :  { %1324 = vperm.xlu2 %2115, %v2243_v58  }
 0x55d   :  { %1320 = vperm.xlu1 %2114, %v2245_v2  }
 0x561   :  { %2119 = vset.pattern.permute.xlu0 %v2294_v28 }
 0x564   :  { %2118 = vset.pattern.permute.xlu2 %v2293_v9 }
 0x565   :  { %2117 = vset.pattern.permute.xlu1 %v2293_v9  ;;  %1344 = vperm.xlu2 %2118, %v2245_v2  }
 0x566   :  { %1340 = vperm.xlu1 %2117, %v2239_v14  }
 0x56d   :  { %2121 = vset.pattern.permute.xlu2 %v2294_v28 }
 0x56e   :  { %1348 = vperm.xlu1 %2117, %v2243_v58  }
 0x576   :  { %2120 = vset.pattern.permute.xlu1 %v2294_v28 }
 0x584   :  { %v1209_v20 = vpop.permute.xlu2 %1208 }
 0x585   :  { %1220 = vst.msk [vmem:[%s3243_s5 + $0x8] sm:$0xff] %vm1218_vm6, %v1209_v20 }
 0x594   :  { %v1267_v42 = vpop.permute.xlu2 %1266 }
 0x595   :  { %v1280_v62 = vmul.f32 %v2776_v35, %v1267_v42 }
 0x597   :  { %v1284_v24 = vadd.f32 %v2730_v53, %v1280_v62 }
 0x59d   :  { %v1207_v56 = vpop.permute.xlu1 %1206  ;;  %v1289_v17 = vpop.permute.xlu2 %1288 }
 0x59e   :  { %1219 = vst.msk [vmem:[%s3243_s5] sm:$0xff] %vm1218_vm6, %v1207_v56  ;;  %v1303_v47 = vmul.f32 %v2736_v50, %v1289_v17 }
 0x5a5   :  { %v1213_v27 = vpop.permute.xlu1 %1212  ;;  %v1297_v40 = vpop.permute.xlu2 %1296 }
 0x5a6   :  { %1222 = vst.msk [vmem:[%s3243_s5 + $0x18] sm:$0xff] %vm1218_vm6, %v1213_v27  ;;  %v1305_v49 = vmul.f32 %v2736_v50, %v1297_v40 }
 0x5ad   :  { %v1262_v36 = vpop.permute.xlu1 %1261 }
 0x5ae   :  { %v1317_v59 = vpop.permute.xlu2 %1316  ;;  %v1279_v32 = vmul.f32 %v2776_v35, %v1262_v36 }
 0x5af   :  { %v1328_v37 = vmul.f32 %v2786_v46, %v1317_v59 }
 0x5b0   :  { %v1211_v38 = vpop.permute.xlu0 %1210  ;;  %v1283_v5 = vadd.f32 %v2730_v53, %v1279_v32 }
 0x5b1   :  { %1221 = vst.msk [vmem:[%s3243_s5 + $0x10] sm:$0xff] %vm1218_vm6, %v1211_v38 }
 0x5b2   :  { %v1307_v18 = vadd.f32 %v1303_v47, %v1283_v5 }
 0x5b5   :  { %v1277_v8 = vpop.permute.xlu1 %1276 }
 0x5b6   :  { %v1325_v55 = vpop.permute.xlu2 %1324  ;;  %v1282_v44 = vmul.f32 %v2776_v35, %v1277_v8 }
 0x5b7   :  { %v1330_v13 = vmul.f32 %v2786_v46, %v1325_v55 }
 0x5b8   :  { %v1286_v4 = vadd.f32 %v2730_v53, %v1282_v44  ;;  %v3022_v44 = vld [vmem:[%s3240_s4] ss:$0 sm:$0xff] }
 0x5b9   :  { %v1272_v16 = vpop.permute.xlu0 %1271 }
 0x5ba   :  { %v1281_v31 = vmul.f32 %v2776_v35, %v1272_v16 }
 0x5bc   :  { %v1285_v60 = vadd.f32 %v2730_v53, %v1281_v31 }
 0x5be   :  { %v1293_v22 = vpop.permute.xlu1 %1292  ;;  %v1309_v29 = vadd.f32 %v1305_v49, %v1285_v60 }
 0x5bf   :  { %v1345_v52 = vpop.permute.xlu2 %1344  ;;  %v1304_v21 = vmul.f32 %v2736_v50, %v1293_v22 }
 0x5c0   :  { %v1353_v3 = vmul.f32 %v2795_v43, %v1345_v52 }
 0x5c1   :  { %v1308_v61 = vadd.f32 %v1304_v21, %v1284_v24 }
 0x5c2   :  { %v1301_v30 = vpop.permute.xlu0 %1300 }
 0x5c3   :  { %v1306_v23 = vmul.f32 %v2736_v50, %v1301_v30  ;;  %v1332_v14 = vadd.f32 %v1328_v37, %v1308_v61 }
 0x5c5   :  { %v1310_v41 = vadd.f32 %v1306_v23, %v1286_v4 }
 0x5c7   :  { %v1313_v34 = vpop.permute.xlu1 %1312  ;;  %v1334_v51 = vadd.f32 %v1330_v13, %v1310_v41  ;;  %v3031_v41 = vld [vmem:[%s3239_s3 + $0x1] ss:$0 sm:$0xff] }
 0x5c8   :  { %v1327_v19 = vmul.f32 %v2786_v46, %v1313_v34 }
 0x5ca   :  { %v1331_v48 = vadd.f32 %v1327_v19, %v1307_v18 }
 0x5cb   :  { %v1337_v57 = vpop.permute.xlu0 %1336 }
 0x5cc   :  { %v1351_v39 = vmul.f32 %v2795_v43, %v1337_v57 }
 0x5ce   :  { %v1355_v6 = vadd.f32 %v1351_v39, %v1331_v48 }
 0x5cf   :  { %v1321_v11 = vpop.permute.xlu1 %1320 }
 0x5d0   :  { %v1329_v26 = vmul.f32 %v2786_v46, %v1321_v11  ;;  %1363 = vrot.lane.b32.xlu2 %v1355_v6, %s2304_s21 }
 0x5d2   :  { %v1333_v10 = vadd.f32 %v1329_v26, %v1309_v29 }
 0x5d4   :  { %v1357_v25 = vadd.f32 %v1353_v3, %v1333_v10 }
 0x5d6   :  { %1367 = vrot.lane.b32.xlu1 %v1357_v25, %s2304_s21 }
 0x5d8   :  { %v1341_v54 = vpop.permute.xlu1 %1340 }
 0x5d9   :  { %v1352_v45 = vmul.f32 %v2795_v43, %v1341_v54 }
 0x5db   :  { %v1356_v12 = vadd.f32 %v1352_v45, %v1332_v14 }
 0x5dd   :  { %1365 = vrot.lane.b32.xlu0 %v1356_v12, %s2304_s21 }
 0x5de   :  { %1385 = vperm.xlu1 %2120, %v1356_v12  }
 0x5e0   :  { %v1349_v33 = vpop.permute.xlu1 %1348 }
 0x5e1   :  { %v1354_v63 = vmul.f32 %v2795_v43, %v1349_v33 }
 0x5e3   :  { %v1358_v58 = vadd.f32 %v1354_v63, %v1334_v51 }
 0x5e5   :  { %1381 = vperm.xlu0 %2119, %v1355_v6   ;;  %1369 = vrot.lane.b32.xlu2 %v1358_v58, %s2304_s21 }
 0x5e6   :  { %1393 = vperm.xlu1 %2120, %v1358_v58  }
 0x5ed   :  { %1389 = vperm.xlu2 %2121, %v1357_v25   ;;  %2123 = vset.pattern.permute.xlu0 %v2291_v1 }
 0x5ee   :  { %2124 = vset.pattern.permute.xlu1 %v2291_v1 }
 0x5f5   :  { %2122 = vset.pattern.permute.xlu2 %v2291_v1 }
 0x62a   :  { %v1364_v2 = vpop.permute.xlu2 %1363 }
 0x62b   :  { %1376 = vst.msk [vmem:[%s3243_s5] sm:$0xff] %vm1375_vm7, %v1364_v2 }
 0x63f   :  { %v1370_v20 = vpop.permute.xlu2 %1369 }
 0x640   :  { %1379 = vst.msk [vmem:[%s3243_s5 + $0x18] sm:$0xff] %vm1375_vm7, %v1370_v20 }
 0x647   :  { %v1390_v42 = vpop.permute.xlu2 %1389 }
 0x648   :  { %v1398_v56 = vmul.f32 %v2745_v15, %v1390_v42  ;;  %v1368_v27 = vpop.permute.xlu1 %1367 }
 0x649   :  { %1378 = vst.msk [vmem:[%s3243_s5 + $0x10] sm:$0xff] %vm1375_vm7, %v1368_v27 }
 0x64a   :  { %v1402_v17 = vadd.f32 %v1398_v56, %v1357_v25 }
 0x64c   :  { %2246 = vtanh.f32 %v1402_v17 }
 0x64f   :  { %v1366_v36 = vpop.permute.xlu0 %1365 }
 0x650   :  { %1377 = vst.msk [vmem:[%s3243_s5 + $0x8] sm:$0xff] %vm1375_vm7, %v1366_v36  ;;  %v1386_v38 = vpop.permute.xlu1 %1385 }
 0x651   :  { %v1397_v40 = vmul.f32 %v2745_v15, %v1386_v38 }
 0x652   :  { %v2247_v8 = vpop.eup %2246 }
 0x653   :  { %v1401_v16 = vadd.f32 %v1397_v40, %v1356_v12  ;;  %1420 = vperm.xlu1 %2124, %v2247_v8  }
 0x655   :  { %2248 = vtanh.f32 %v1401_v16 }
 0x657   :  { %v1382_v59 = vpop.permute.xlu0 %1381 }
 0x658   :  { %v1396_v22 = vmul.f32 %v2745_v15, %v1382_v59  ;;  %v1394_v32 = vpop.permute.xlu1 %1393 }
 0x659   :  { %v1399_v5 = vmul.f32 %v2745_v15, %v1394_v32  ;;  %v3052_v32 = vld [vmem:[%s3241_s2] ss:$0 sm:$0xff] }
 0x65a   :  { %v1400_v30 = vadd.f32 %v1396_v22, %v1355_v6 }
 0x65b   :  { %v2249_v55 = vpop.eup %2248  ;;  %2125 = vset.pattern.permute.xlu1 %v2290_v0  ;;  %v1403_v34 = vadd.f32 %v1399_v5, %v1358_v58 }
 0x65c   :  { %2250 = vtanh.f32 %v1400_v30  ;;  %1415 = vperm.xlu0 %2123, %v2249_v55  }
 0x65d   :  { %2252 = vtanh.f32 %v1403_v34 }
 0x662   :  { %v2251_v47 = vpop.eup %2250 }
 0x663   :  { %1437 = vperm.xlu1 %2125, %v2251_v47   ;;  %1410 = vperm.xlu2 %2122, %v2251_v47   ;;  %v2253_v31 = vpop.eup %2252 }
 0x664   :  { %2127 = vset.pattern.permute.xlu0 %v2290_v0 }
 0x665   :  { %1445 = vperm.xlu0 %2127, %v2247_v8  }
 0x66b   :  { %1449 = vperm.xlu1 %2125, %v2253_v31   ;;  %1425 = vperm.xlu2 %2122, %v2253_v31  }
 0x66d   :  { %2130 = vset.pattern.permute.xlu0 %v2292_v7 }
 0x66e   :  { %1473 = vperm.xlu0 %2130, %v2253_v31  }
 0x673   :  { %2129 = vset.pattern.permute.xlu1 %v2292_v7  ;;  %2126 = vset.pattern.permute.xlu2 %v2290_v0 }
 0x674   :  { %1465 = vperm.xlu1 %2129, %v2249_v55   ;;  %1441 = vperm.xlu2 %2126, %v2249_v55  }
 0x676   :  { %2135 = vset.pattern.permute.xlu0 %v2294_v28 }
 0x67c   :  { %2131 = vset.pattern.permute.xlu1 %v2293_v9  ;;  %2128 = vset.pattern.permute.xlu2 %v2292_v7 }
 0x67d   :  { %1485 = vperm.xlu1 %2131, %v2251_v47   ;;  %1461 = vperm.xlu2 %2128, %v2251_v47  }
 0x685   :  { %1493 = vperm.xlu1 %2131, %v2247_v8   ;;  %1469 = vperm.xlu2 %2128, %v2247_v8  }
 0x68d   :  { %2132 = vset.pattern.permute.xlu2 %v2293_v9  ;;  %2133 = vset.pattern.permute.xlu1 %v2294_v28 }
 0x68e   :  { %1489 = vperm.xlu2 %2132, %v2249_v55  }
 0x696   :  { %1497 = vperm.xlu2 %2132, %v2253_v31  }
 0x69e   :  { %2134 = vset.pattern.permute.xlu2 %v2294_v28 }
 0x6bd   :  { %v1411_v15 = vpop.permute.xlu2 %1410 }
 0x6be   :  { %v1428_v29 = vmul.f32 %v2776_v35, %v1411_v15 }
 0x6c5   :  { %v1426_v19 = vpop.permute.xlu2 %1425  ;;  %v1421_v18 = vpop.permute.xlu1 %1420 }
 0x6c6   :  { %v1431_v45 = vmul.f32 %v2776_v35, %v1426_v19  ;;  %v1430_v4 = vmul.f32 %v2776_v35, %v1421_v18 }
 0x6c8   :  { %v1435_v63 = vadd.f32 %v3022_v44, %v1431_v45  ;;  %v1434_v42 = vadd.f32 %v3022_v44, %v1430_v4 }
 0x6ce   :  { %v1442_v57 = vpop.permute.xlu2 %1441  ;;  %v1416_v39 = vpop.permute.xlu0 %1415 }
 0x6cf   :  { %v1429_v6 = vmul.f32 %v2776_v35, %v1416_v39  ;;  %v1453_v11 = vmul.f32 %v2736_v50, %v1442_v57 }
 0x6d1   :  { %v1433_v52 = vadd.f32 %v2730_v53, %v1429_v6  ;;  %v1432_v53 = vadd.f32 %v3022_v44, %v1428_v29 }
 0x6d3   :  { %v1457_v3 = vadd.f32 %v1453_v11, %v1433_v52 }
 0x6d5   :  { %v1438_v60 = vpop.permute.xlu1 %1437 }
 0x6d6   :  { %v1452_v24 = vmul.f32 %v2736_v50, %v1438_v60 }
 0x6d7   :  { %v1462_v48 = vpop.permute.xlu2 %1461  ;;  %v1446_v21 = vpop.permute.xlu0 %1445 }
 0x6d8   :  { %v1456_v23 = vadd.f32 %v1452_v24, %v1432_v53  ;;  %v1476_v14 = vmul.f32 %v2786_v46, %v1462_v48  ;;  %v1454_v58 = vmul.f32 %v3031_v41, %v1446_v21 }
 0x6da   :  { %v1480_v12 = vadd.f32 %v1476_v14, %v1456_v23  ;;  %v1458_v17 = vadd.f32 %v1454_v58, %v1434_v42 }
 0x6dd   :  { %v1450_v49 = vpop.permute.xlu1 %1449 }
 0x6de   :  { %v1455_v13 = vmul.f32 %v3031_v41, %v1450_v49 }
 0x6df   :  { %v1470_v62 = vpop.permute.xlu2 %1469 }
 0x6e0   :  { %v1474_v51 = vpop.permute.xlu0 %1473  ;;  %v1459_v35 = vadd.f32 %v1455_v13, %v1435_v63  ;;  %v1478_v56 = vmul.f32 %v2786_v46, %v1470_v62  ;;  %v3095_v13 = vld [vmem:[%s3239_s3 + $0x2] ss:$0 sm:$0xff] }
 0x6e1   :  { %v1479_v27 = vmul.f32 %v2786_v46, %v1474_v51 }
 0x6e2   :  { %v1482_v40 = vadd.f32 %v1478_v56, %v1458_v17  ;;  %v3103_v17 = vld [vmem:[%s3239_s3 + $0x3] ss:$0 sm:$0xff] }
 0x6e3   :  { %v1483_v8 = vadd.f32 %v1479_v27, %v1459_v35 }
 0x6e6   :  { %v1466_v26 = vpop.permute.xlu1 %1465 }
 0x6e7   :  { %v1477_v10 = vmul.f32 %v2786_v46, %v1466_v26 }
 0x6e8   :  { %v1490_v25 = vpop.permute.xlu2 %1489 }
 0x6e9   :  { %v1481_v61 = vadd.f32 %v1477_v10, %v1457_v3  ;;  %v1501_v37 = vmul.f32 %v2795_v43, %v1490_v25 }
 0x6eb   :  { %v1505_v54 = vadd.f32 %v1501_v37, %v1481_v61 }
 0x6ed   :  { %1514 = vrot.lane.b32.xlu1 %v1505_v54, %s2305_s6 }
 0x6ef   :  { %v1486_v50 = vpop.permute.xlu1 %1485 }
 0x6f0   :  { %v1500_v33 = vmul.f32 %v2795_v43, %v1486_v50  ;;  %v1498_v20 = vpop.permute.xlu2 %1497 }
 0x6f1   :  { %v1503_v36 = vmul.f32 %v2795_v43, %v1498_v20 }
 0x6f2   :  { %v1504_v2 = vadd.f32 %v1500_v33, %v1480_v12 }
 0x6f3   :  { %v1507_v59 = vadd.f32 %v1503_v36, %v1483_v8 }
 0x6f4   :  { %1512 = vrot.lane.b32.xlu0 %v1504_v2, %s2305_s6 }
 0x6f5   :  { %1530 = vperm.xlu1 %2133, %v1504_v2  }
 0x6f7   :  { %v1494_v38 = vpop.permute.xlu1 %1493 }
 0x6f8   :  { %v1502_v16 = vmul.f32 %v2795_v43, %v1494_v38 }
 0x6fa   :  { %v1506_v22 = vadd.f32 %v1502_v16, %v1482_v40 }
 0x6fc   :  { %1516 = vrot.lane.b32.xlu2 %v1506_v22, %s2305_s6  ;;  %1518 = vrot.lane.b32.xlu0 %v1507_v59, %s2305_s6 }
 0x6fd   :  { %1542 = vperm.xlu1 %2133, %v1507_v59  }
 0x704   :  { %1534 = vperm.xlu2 %2134, %v1505_v54   ;;  %1538 = vperm.xlu0 %2135, %v1506_v22  }
 0x705   :  { %2137 = vset.pattern.permute.xlu1 %v2291_v1 }
 0x70c   :  { %2136 = vset.pattern.permute.xlu2 %v2291_v1  ;;  %2138 = vset.pattern.permute.xlu0 %v2291_v1 }
 0x756   :  { %v1517_v46 = vpop.permute.xlu2 %1516 }
 0x757   :  { %1527 = vst.msk [vmem:[%s3243_s5 + $0x10] sm:$0xff] %vm1524_vm8, %v1517_v46 }
 0x75e   :  { %v1535_v43 = vpop.permute.xlu2 %1534 }
 0x75f   :  { %v1546_v30 = vmul.f32 %v3052_v32, %v1535_v43  ;;  %v1515_v55 = vpop.permute.xlu1 %1514 }
 0x760   :  { %1526 = vst.msk [vmem:[%s3243_s5 + $0x8] sm:$0xff] %vm1524_vm8, %v1515_v55 }
 0x761   :  { %v1550_v5 = vadd.f32 %v1546_v30, %v1505_v54  ;;  %v3084_v54 = vld [vmem:[%s3239_s3] ss:$0 sm:$0xff] }
 0x763   :  { %2254 = vtanh.f32 %v1550_v5 }
 0x766   :  { %v1513_v34 = vpop.permute.xlu0 %1512 }
 0x767   :  { %1525 = vst.msk [vmem:[%s3243_s5] sm:$0xff] %vm1524_vm8, %v1513_v34  ;;  %v1531_v47 = vpop.permute.xlu1 %1530 }
 0x768   :  { %v1545_v31 = vmul.f32 %v3052_v32, %v1531_v47 }
 0x769   :  { %v2255_v15 = vpop.eup %2254 }
 0x76a   :  { %v1549_v19 = vadd.f32 %v1545_v31, %v1504_v2  ;;  %1564 = vperm.xlu1 %2137, %v2255_v15  }
 0x76c   :  { %2256 = vtanh.f32 %v1549_v19 }
 0x76e   :  { %v1519_v18 = vpop.permute.xlu0 %1518 }
 0x76f   :  { %1528 = vst.msk [vmem:[%s3243_s5 + $0x18] sm:$0xff] %vm1524_vm8, %v1519_v18  ;;  %v1543_v57 = vpop.permute.xlu1 %1542 }
 0x770   :  { %v1548_v60 = vmul.f32 %v3052_v32, %v1543_v57 }
 0x772   :  { %v2257_v48 = vpop.eup %2256  ;;  %v1552_v39 = vadd.f32 %v1548_v60, %v1507_v59  ;;  %2139 = vset.pattern.permute.xlu1 %v2290_v0 }
 0x773   :  { %1559 = vperm.xlu2 %2136, %v2257_v48   ;;  %1586 = vperm.xlu1 %2139, %v2257_v48  }
 0x774   :  { %2258 = vtanh.f32 %v1552_v39 }
 0x776   :  { %v1539_v49 = vpop.permute.xlu0 %1538 }
 0x777   :  { %v1547_v6 = vmul.f32 %v3052_v32, %v1539_v49 }
 0x779   :  { %v1551_v62 = vadd.f32 %v1547_v6, %v1506_v22 }
 0x77a   :  { %v2259_v52 = vpop.eup %2258 }
 0x77b   :  { %2260 = vtanh.f32 %v1551_v62  ;;  %1574 = vperm.xlu0 %2138, %v2259_v52  }
 0x781   :  { %v2261_v11 = vpop.eup %2260 }
 0x782   :  { %1594 = vperm.xlu1 %2139, %v2261_v11   ;;  %1569 = vperm.xlu2 %2136, %v2261_v11  }
 0x783   :  { %2141 = vset.pattern.permute.xlu0 %v2292_v7 }
 0x784   :  { %1610 = vperm.xlu0 %2141, %v2257_v48  }
 0x78a   :  { %2142 = vset.pattern.permute.xlu1 %v2292_v7  ;;  %2140 = vset.pattern.permute.xlu2 %v2290_v0 }
 0x78b   :  { %1614 = vperm.xlu1 %2142, %v2255_v15   ;;  %1590 = vperm.xlu2 %2140, %v2255_v15  }
 0x78c   :  { %2145 = vset.pattern.permute.xlu0 %v2293_v9 }
 0x78d   :  { %1638 = vperm.xlu0 %2145, %v2255_v15  }
 0x793   :  { %1622 = vperm.xlu1 %2142, %v2259_v52   ;;  %1598 = vperm.xlu2 %2140, %v2259_v52  }
 0x795   :  { %2148 = vset.pattern.permute.xlu0 %v2294_v28 }
 0x79b   :  { %2146 = vset.pattern.permute.xlu1 %v2293_v9  ;;  %2143 = vset.pattern.permute.xlu2 %v2292_v7 }
 0x79c   :  { %1642 = vperm.xlu1 %2146, %v2261_v11   ;;  %1618 = vperm.xlu2 %2143, %v2261_v11  }
 0x7a4   :  { %2144 = vset.pattern.permute.xlu2 %v2293_v9  ;;  %2149 = vset.pattern.permute.xlu1 %v2294_v28 }
 0x7a5   :  { %1634 = vperm.xlu2 %2144, %v2257_v48  }
 0x7ad   :  { %1646 = vperm.xlu2 %2144, %v2259_v52  }
 0x7b5   :  { %2147 = vset.pattern.permute.xlu2 %v2294_v28 }
 0x7cd   :  { %v1560_v29 = vpop.permute.xlu2 %1559 }
 0x7ce   :  { %v1577_v23 = vmul.f32 %v3084_v54, %v1560_v29 }
 0x7d0   :  { %v1581_v4 = vadd.f32 %v3022_v44, %v1577_v23 }
 0x7dc   :  { %v1570_v26 = vpop.permute.xlu2 %1569  ;;  %v1565_v21 = vpop.permute.xlu1 %1564 }
 0x7dd   :  { %v1578_v14 = vmul.f32 %v3084_v54, %v1565_v21  ;;  %v1579_v22 = vmul.f32 %v3084_v54, %v1570_v26 }
 0x7df   :  { %v1582_v12 = vadd.f32 %v3022_v44, %v1578_v14  ;;  %v1583_v31 = vadd.f32 %v3022_v44, %v1579_v22 }
 0x7e5   :  { %v1591_v3 = vpop.permute.xlu2 %1590  ;;  %v1587_v10 = vpop.permute.xlu1 %1586 }
 0x7e6   :  { %v1601_v45 = vmul.f32 %v3031_v41, %v1587_v10  ;;  %v1602_v50 = vmul.f32 %v3031_v41, %v1591_v3 }
 0x7e8   :  { %v1605_v63 = vadd.f32 %v1601_v45, %v1581_v4  ;;  %v1606_v58 = vadd.f32 %v1602_v50, %v1582_v12 }
 0x7ed   :  { %v1599_v24 = vpop.permute.xlu2 %1598  ;;  %v1575_v25 = vpop.permute.xlu0 %1574 }
 0x7ee   :  { %v1580_v2 = vmul.f32 %v3084_v54, %v1575_v25  ;;  %v1604_v59 = vmul.f32 %v3031_v41, %v1599_v24 }
 0x7f0   :  { %v1584_v40 = vadd.f32 %v3022_v44, %v1580_v2 }
 0x7f2   :  { %v1608_v43 = vadd.f32 %v1604_v59, %v1584_v40 }
 0x7f4   :  { %v1595_v61 = vpop.permute.xlu1 %1594 }
 0x7f5   :  { %v1603_v55 = vmul.f32 %v3031_v41, %v1595_v61 }
 0x7f6   :  { %v1619_v37 = vpop.permute.xlu2 %1618  ;;  %v1611_v53 = vpop.permute.xlu0 %1610 }
 0x7f7   :  { %v1625_v33 = vmul.f32 %v3095_v13, %v1611_v53  ;;  %v1607_v19 = vadd.f32 %v1603_v55, %v1583_v31  ;;  %v1627_v18 = vmul.f32 %v3095_v13, %v1619_v37 }
 0x7f9   :  { %v1629_v56 = vadd.f32 %v1625_v33, %v1605_v63  ;;  %v1631_v60 = vadd.f32 %v1627_v18, %v1607_v19 }
 0x7fd   :  { %v1615_v51 = vpop.permute.xlu1 %1614 }
 0x7fe   :  { %v1626_v20 = vmul.f32 %v3095_v13, %v1615_v51 }
 0x7ff   :  { %v1635_v42 = vpop.permute.xlu2 %1634  ;;  %v1639_v35 = vpop.permute.xlu0 %1638 }
 0x800   :  { %v1630_v27 = vadd.f32 %v1626_v20, %v1606_v58  ;;  %v1649_v36 = vmul.f32 %v3103_v17, %v1635_v42  ;;  %v1650_v38 = vmul.f32 %v3103_v17, %v1639_v35 }
 0x802   :  { %v1653_v8 = vadd.f32 %v1649_v36, %v1629_v56  ;;  %v1654_v16 = vadd.f32 %v1650_v38, %v1630_v27 }
 0x804   :  { %1661 = vrot.lane.b32.xlu1 %v1653_v8, %s2306_s22  ;;  %1663 = vrot.lane.b32.xlu2 %v1654_v16, %s2306_s22 }
 0x805   :  { %v1623_v46 = vpop.permute.xlu1 %1622 }
 0x806   :  { %v1628_v30 = vmul.f32 %v3095_v13, %v1623_v46 }
 0x807   :  { %v1647_v5 = vpop.permute.xlu2 %1646 }
 0x808   :  { %v1632_v34 = vadd.f32 %v1628_v30, %v1608_v43  ;;  %v1652_v47 = vmul.f32 %v3103_v17, %v1647_v5 }
 0x80a   :  { %v1656_v15 = vadd.f32 %v1652_v47, %v1632_v34 }
 0x80c   :  { %1667 = vrot.lane.b32.xlu1 %v1656_v15, %s2306_s22  ;;  %1679 = vperm.xlu2 %2147, %v1653_v8  }
 0x80e   :  { %v1643_v57 = vpop.permute.xlu1 %1642 }
 0x80f   :  { %v1651_v48 = vmul.f32 %v3103_v17, %v1643_v57 }
 0x811   :  { %v1655_v39 = vadd.f32 %v1651_v48, %v1631_v60 }
 0x813   :  { %1665 = vrot.lane.b32.xlu0 %v1655_v39, %s2306_s22 }
 0x814   :  { %1687 = vperm.xlu1 %2149, %v1655_v39   ;;  %1691 = vperm.xlu2 %2147, %v1656_v15  }
 0x81b   :  { %1683 = vperm.xlu0 %2148, %v1654_v16  }
 0x81c   :  { %2150 = vset.pattern.permute.xlu1 %v2291_v1  ;;  %2151 = vset.pattern.permute.xlu2 %v2291_v1 }
 0x823   :  { %2152 = vset.pattern.permute.xlu0 %v2291_v1 }
 0x85e   :  { %v1664_v49 = vpop.permute.xlu2 %1663 }
 0x85f   :  { %1675 = vst.msk [vmem:[%s3243_s5 + $0x8] sm:$0xff] %vm1673_vm9, %v1664_v49 }
 0x866   :  { %v1680_v6 = vpop.permute.xlu2 %1679 }
 0x867   :  { %v1694_v62 = vmul.f32 %v3052_v32, %v1680_v6 }
 0x869   :  { %v1698_v52 = vadd.f32 %v1694_v62, %v1653_v8 }
 0x86b   :  { %2262 = vtanh.f32 %v1698_v52 }
 0x86e   :  { %v1692_v11 = vpop.permute.xlu2 %1691 }
 0x86f   :  { %v1697_v29 = vmul.f32 %v3052_v32, %v1692_v11 }
 0x871   :  { %v2263_v26 = vpop.eup %2262  ;;  %v1701_v21 = vadd.f32 %v1697_v29, %v1656_v15 }
 0x872   :  { %1708 = vperm.xlu1 %2150, %v2263_v26  }
 0x873   :  { %2264 = vtanh.f32 %v1701_v21 }
 0x876   :  { %v1662_v3 = vpop.permute.xlu1 %1661 }
 0x877   :  { %1674 = vst.msk [vmem:[%s3243_s5] sm:$0xff] %vm1673_vm9, %v1662_v3 }
 0x879   :  { %v2265_v10 = vpop.eup %2264 }
 0x87a   :  { %1723 = vperm.xlu1 %2150, %v2265_v10  }
 0x87e   :  { %v1668_v24 = vpop.permute.xlu1 %1667 }
 0x87f   :  { %1677 = vst.msk [vmem:[%s3243_s5 + $0x18] sm:$0xff] %vm1673_vm9, %v1668_v24 }
 0x882   :  { %2154 = vset.pattern.permute.xlu1 %v2290_v0 }
 0x885   :  { %v1666_v25 = vpop.permute.xlu0 %1665 }
 0x886   :  { %1676 = vst.msk [vmem:[%s3243_s5 + $0x10] sm:$0xff] %vm1673_vm9, %v1666_v25  ;;  %v1688_v61 = vpop.permute.xlu1 %1687 }
 0x887   :  { %v1696_v37 = vmul.f32 %v3052_v32, %v1688_v61 }
 0x889   :  { %v1700_v53 = vadd.f32 %v1696_v37, %v1655_v39 }
 0x88b   :  { %2266 = vtanh.f32 %v1700_v53 }
 0x88d   :  { %v1684_v23 = vpop.permute.xlu0 %1683 }
 0x88e   :  { %v1695_v14 = vmul.f32 %v3052_v32, %v1684_v23 }
 0x890   :  { %v1699_v45 = vadd.f32 %v1695_v14, %v1654_v16 }
 0x891   :  { %v2267_v50 = vpop.eup %2266 }
 0x892   :  { %2268 = vtanh.f32 %v1699_v45  ;;  %1718 = vperm.xlu0 %2152, %v2267_v50  }
 0x898   :  { %v2269_v4 = vpop.eup %2268 }
 0x899   :  { %1739 = vperm.xlu1 %2154, %v2269_v4   ;;  %1713 = vperm.xlu2 %2151, %v2269_v4  }
 0x89a   :  { %2155 = vset.pattern.permute.xlu0 %v2290_v0 }
 0x89b   :  { %1747 = vperm.xlu0 %2155, %v2265_v10  }
 0x8a1   :  { %2156 = vset.pattern.permute.xlu1 %v2292_v7  ;;  %2153 = vset.pattern.permute.xlu2 %v2290_v0 }
 0x8a2   :  { %1759 = vperm.xlu1 %2156, %v2263_v26   ;;  %1735 = vperm.xlu2 %2153, %v2263_v26  }
 0x8a3   :  { %2158 = vset.pattern.permute.xlu0 %v2293_v9 }
 0x8a4   :  { %1783 = vperm.xlu0 %2158, %v2263_v26  }
 0x8aa   :  { %1767 = vperm.xlu1 %2156, %v2267_v50   ;;  %1743 = vperm.xlu2 %2153, %v2267_v50  }
 0x8ac   :  { %2163 = vset.pattern.permute.xlu0 %v2294_v28 }
 0x8b2   :  { %2159 = vset.pattern.permute.xlu1 %v2293_v9  ;;  %2157 = vset.pattern.permute.xlu2 %v2292_v7 }
 0x8b3   :  { %1787 = vperm.xlu1 %2159, %v2269_v4   ;;  %1763 = vperm.xlu2 %2157, %v2269_v4  }
 0x8bb   :  { %1795 = vperm.xlu1 %2159, %v2265_v10   ;;  %1771 = vperm.xlu2 %2157, %v2265_v10  }
 0x8c3   :  { %2160 = vset.pattern.permute.xlu2 %v2293_v9  ;;  %2161 = vset.pattern.permute.xlu1 %v2294_v28 }
 0x8c4   :  { %1791 = vperm.xlu2 %2160, %v2267_v50  }
 0x8cc   :  { %2162 = vset.pattern.permute.xlu2 %v2294_v28 }
 0x8e4   :  { %v1709_v33 = vpop.permute.xlu1 %1708 }
 0x8e5   :  { %v1726_v35 = vmul.f32 %v3084_v54, %v1709_v33 }
 0x8e7   :  { %v1730_v27 = vadd.f32 %v3022_v44, %v1726_v35 }
 0x8ec   :  { %v1724_v63 = vpop.permute.xlu1 %1723 }
 0x8ed   :  { %v1729_v19 = vmul.f32 %v3084_v54, %v1724_v63 }
 0x8ef   :  { %v1733_v52 = vadd.f32 %v3022_v44, %v1729_v19 }
 0x8f3   :  { %v1714_v12 = vpop.permute.xlu2 %1713 }
 0x8f4   :  { %v1727_v46 = vmul.f32 %v3084_v54, %v1714_v12 }
 0x8f6   :  { %v1731_v5 = vadd.f32 %v3022_v44, %v1727_v46 }
 0x8fc   :  { %v1736_v51 = vpop.permute.xlu2 %1735 }
 0x8fd   :  { %v1750_v56 = vmul.f32 %v3031_v41, %v1736_v51 }
 0x8ff   :  { %v1754_v38 = vadd.f32 %v1750_v56, %v1730_v27 }
 0x904   :  { %v1719_v58 = vpop.permute.xlu0 %1718  ;;  %v1744_v2 = vpop.permute.xlu2 %1743 }
 0x905   :  { %v1728_v34 = vmul.f32 %v3084_v54, %v1719_v58  ;;  %v1752_v48 = vmul.f32 %v3031_v41, %v1744_v2 }
 0x907   :  { %v1732_v18 = vadd.f32 %v3022_v44, %v1728_v34 }
 0x909   :  { %v1756_v29 = vadd.f32 %v1752_v48, %v1732_v18 }
 0x90b   :  { %v1740_v20 = vpop.permute.xlu1 %1739 }
 0x90c   :  { %v1751_v30 = vmul.f32 %v3031_v41, %v1740_v20 }
 0x90d   :  { %v1748_v42 = vpop.permute.xlu0 %1747  ;;  %v1764_v40 = vpop.permute.xlu2 %1763 }
 0x90e   :  { %v1755_v47 = vadd.f32 %v1751_v30, %v1731_v5  ;;  %v1775_v31 = vmul.f32 %v3095_v13, %v1764_v40  ;;  %v1753_v39 = vmul.f32 %v3031_v41, %v1748_v42 }
 0x910   :  { %v1779_v57 = vadd.f32 %v1775_v31, %v1755_v47  ;;  %v1757_v26 = vadd.f32 %v1753_v39, %v1733_v52 }
 0x914   :  { %v1760_v36 = vpop.permute.xlu1 %1759 }
 0x915   :  { %v1774_v8 = vmul.f32 %v3095_v13, %v1760_v36  ;;  %v1772_v55 = vpop.permute.xlu2 %1771 }
 0x916   :  { %v1784_v28 = vpop.permute.xlu0 %1783  ;;  %v1777_v11 = vmul.f32 %v3095_v13, %v1772_v55 }
 0x917   :  { %v1778_v16 = vadd.f32 %v1774_v8, %v1754_v38  ;;  %v1798_v59 = vmul.f32 %v3103_v17, %v1784_v28 }
 0x918   :  { %v1781_v24 = vadd.f32 %v1777_v11, %v1757_v26 }
 0x919   :  { %v1802_v22 = vadd.f32 %v1798_v59, %v1778_v16 }
 0x91b   :  { %1828 = vperm.xlu1 %2161, %v1802_v22   ;;  %1810 = vrot.lane.b32.xlu2 %v1802_v22, %s2307_s1 }
 0x91c   :  { %v1768_v43 = vpop.permute.xlu1 %1767 }
 0x91d   :  { %v1776_v49 = vmul.f32 %v3095_v13, %v1768_v43 }
 0x91e   :  { %v1792_v62 = vpop.permute.xlu2 %1791 }
 0x91f   :  { %v1780_v21 = vadd.f32 %v1776_v49, %v1756_v29  ;;  %v1800_v3 = vmul.f32 %v3103_v17, %v1792_v62 }
 0x921   :  { %v1804_v61 = vadd.f32 %v1800_v3, %v1780_v21 }
 0x925   :  { %v1788_v15 = vpop.permute.xlu1 %1787 }
 0x926   :  { %v1799_v60 = vmul.f32 %v3103_v17, %v1788_v15 }
 0x928   :  { %v1803_v6 = vadd.f32 %v1799_v60, %v1779_v57 }
 0x92a   :  { %1812 = vrot.lane.b32.xlu0 %v1803_v6, %s2307_s1  ;;  %1832 = vperm.xlu2 %2162, %v1803_v6  }
 0x92d   :  { %v1796_v10 = vpop.permute.xlu1 %1795 }
 0x92e   :  { %v1801_v25 = vmul.f32 %v3103_v17, %v1796_v10 }
 0x930   :  { %v1805_v37 = vadd.f32 %v1801_v25, %v1781_v24 }
 0x932   :  { %1836 = vperm.xlu0 %2163, %v1804_v61   ;;  %1840 = vperm.xlu1 %2161, %v1805_v37  }
 0x933   :  { %1814 = vrot.lane.b32.xlu2 %v1804_v61, %s2307_s1 }
 0x934   :  { %2164 = vset.pattern.permute.xlu2 %v2291_v1 }
 0x93a   :  { %1816 = vrot.lane.b32.xlu1 %v1805_v37, %s2307_s1  ;;  %2165 = vset.pattern.permute.xlu0 %v2291_v1 }
 0x93b   :  { %2166 = vset.pattern.permute.xlu1 %v2291_v1 }
 0x975   :  { %v1811_v53 = vpop.permute.xlu2 %1810 }
 0x976   :  { %1823 = vst.msk [vmem:[%s3243_s5] sm:$0xff] %vm1822_vm10, %v1811_v53 }
 0x984   :  { %v1833_v23 = vpop.permute.xlu2 %1832 }
 0x985   :  { %v1844_v14 = vmul.f32 %v3052_v32, %v1833_v23 }
 0x987   :  { %v1848_v45 = vadd.f32 %v1844_v14, %v1803_v6 }
 0x989   :  { %2270 = vtanh.f32 %v1848_v45 }
 0x98d   :  { %v1815_v50 = vpop.permute.xlu2 %1814  ;;  %v1829_v4 = vpop.permute.xlu1 %1828 }
 0x98e   :  { %1825 = vst.msk [vmem:[%s3243_s5 + $0x10] sm:$0xff] %vm1822_vm10, %v1815_v50  ;;  %v1843_v1 = vmul.f32 %v3052_v32, %v1829_v4 }
 0x98f   :  { %v2271_v12 = vpop.eup %2270 }
 0x990   :  { %v1847_v33 = vadd.f32 %v1843_v1, %v1802_v22  ;;  %1862 = vperm.xlu0 %2165, %v2271_v12  }
 0x992   :  { %2272 = vtanh.f32 %v1847_v33 }
 0x998   :  { %v2273_v51 = vpop.eup %2272  ;;  %2169 = vset.pattern.permute.xlu0 %v2290_v0 }
 0x999   :  { %1857 = vperm.xlu2 %2164, %v2273_v51  }
 0x99c   :  { %v1813_v63 = vpop.permute.xlu0 %1812 }
 0x99d   :  { %1824 = vst.msk [vmem:[%s3243_s5 + $0x8] sm:$0xff] %vm1822_vm10, %v1813_v63 }
 0x9a4   :  { %v1841_v58 = vpop.permute.xlu1 %1840  ;;  %v1837_v2 = vpop.permute.xlu0 %1836 }
 0x9a5   :  { %v1846_v20 = vmul.f32 %v3052_v32, %v1841_v58  ;;  %v1845_v42 = vmul.f32 %v3052_v32, %v1837_v2 }
 0x9a7   :  { %v1850_v35 = vadd.f32 %v1846_v20, %v1805_v37  ;;  %v1849_v56 = vadd.f32 %v1845_v42, %v1804_v61 }
 0x9a9   :  { %2274 = vtanh.f32 %v1850_v35 }
 0x9aa   :  { %2276 = vtanh.f32 %v1849_v56 }
 0x9ac   :  { %v1817_v27 = vpop.permute.xlu1 %1816 }
 0x9ad   :  { %1826 = vst.msk [vmem:[%s3243_s5 + $0x18] sm:$0xff] %vm1822_vm10, %v1817_v27 }
 0x9af   :  { %v2275_v36 = vpop.eup %2274 }
 0x9b0   :  { %v2277_v38 = vpop.eup %2276  ;;  %1872 = vperm.xlu2 %2164, %v2275_v36  }
 0x9b1   :  { %1892 = vperm.xlu0 %2169, %v2277_v38   ;;  %1867 = vperm.xlu1 %2166, %v2277_v38  }
 0x9b8   :  { %2168 = vset.pattern.permute.xlu2 %v2290_v0 }
 0x9b9   :  { %2172 = vset.pattern.permute.xlu0 %v2292_v7  ;;  %2167 = vset.pattern.permute.xlu1 %v2290_v0 }
 0x9ba   :  { %1888 = vperm.xlu2 %2168, %v2271_v12   ;;  %1920 = vperm.xlu0 %2172, %v2275_v36  }
 0x9bb   :  { %1884 = vperm.xlu1 %2167, %v2273_v51  }
 0x9c2   :  { %2170 = vset.pattern.permute.xlu2 %v2292_v7  ;;  %2175 = vset.pattern.permute.xlu0 %v2293_v9 }
 0x9c3   :  { %1896 = vperm.xlu1 %2167, %v2275_v36   ;;  %1908 = vperm.xlu2 %2170, %v2273_v51  }
 0x9cb   :  { %2171 = vset.pattern.permute.xlu1 %v2292_v7  ;;  %1916 = vperm.xlu2 %2170, %v2277_v38  }
 0x9cc   :  { %1912 = vperm.xlu1 %2171, %v2271_v12  }
 0x9d3   :  { %2174 = vset.pattern.permute.xlu2 %v2293_v9 }
 0x9d4   :  { %2173 = vset.pattern.permute.xlu1 %v2293_v9  ;;  %1936 = vperm.xlu2 %2174, %v2271_v12  }
 0x9d5   :  { %1932 = vperm.xlu1 %2173, %v2273_v51  }
 0x9dc   :  { %1944 = vperm.xlu2 %2174, %v2275_v36  }
 0x9dd   :  { %1940 = vperm.xlu1 %2173, %v2277_v38  }
 0x9f3   :  { %v1858_v0 = vpop.permute.xlu2 %1857 }
 0x9f4   :  { %v1875_v9 = vmul.f32 %v3084_v54, %v1858_v0 }
 0x9f6   :  { %v1879_v57 = vadd.f32 %v3022_v44, %v1875_v9 }
 0xa02   :  { %v1863_v46 = vpop.permute.xlu0 %1862 }
 0xa03   :  { %v1876_v7 = vmul.f32 %v3084_v54, %v1863_v46 }
 0xa05   :  { %v1880_v30 = vadd.f32 %v3022_v44, %v1876_v7 }
 0xa0a   :  { %v1873_v32 = vpop.permute.xlu2 %1872 }
 0xa0b   :  { %v1878_v48 = vmul.f32 %v3084_v54, %v1873_v32 }
 0xa0d   :  { %v1882_v11 = vadd.f32 %v3022_v44, %v1878_v48 }
 0xa14   :  { %v1889_v40 = vpop.permute.xlu2 %1888 }
 0xa15   :  { %v1900_v43 = vmul.f32 %v3031_v41, %v1889_v40 }
 0xa17   :  { %v1904_v34 = vadd.f32 %v1900_v43, %v1880_v30 }
 0xa1d   :  { %v1909_v28 = vpop.permute.xlu2 %1908 }
 0xa1e   :  { %v1923_v6 = vmul.f32 %v3095_v13, %v1909_v28 }
 0xa23   :  { %v1868_v8 = vpop.permute.xlu1 %1867  ;;  %v1893_v47 = vpop.permute.xlu0 %1892 }
 0xa24   :  { %v1877_v39 = vmul.f32 %v3084_v54, %v1868_v8  ;;  %v1901_v10 = vmul.f32 %v3031_v41, %v1893_v47 }
 0xa25   :  { %v1917_v59 = vpop.permute.xlu2 %1916 }
 0xa26   :  { %v1881_v29 = vadd.f32 %v3022_v44, %v1877_v39  ;;  %v1925_v53 = vmul.f32 %v3095_v13, %v1917_v59 }
 0xa28   :  { %v1905_v25 = vadd.f32 %v1901_v10, %v1881_v29 }
 0xa2a   :  { %v1929_v45 = vadd.f32 %v1925_v53, %v1905_v25 }
 0xa2c   :  { %v1921_v3 = vpop.permute.xlu0 %1920 }
 0xa2d   :  { %v1885_v16 = vpop.permute.xlu1 %1884  ;;  %v1926_v61 = vmul.f32 %v3095_v13, %v1921_v3 }
 0xa2e   :  { %v1937_v55 = vpop.permute.xlu2 %1936  ;;  %v1899_v15 = vmul.f32 %v3031_v41, %v1885_v16 }
 0xa2f   :  { %v1948_v19 = vmul.f32 %v3103_v17, %v1937_v55 }
 0xa30   :  { %v1903_v49 = vadd.f32 %v1899_v15, %v1879_v57 }
 0xa32   :  { %v1927_v26 = vadd.f32 %v1923_v6, %v1903_v49 }
 0xa35   :  { %v1897_v22 = vpop.permute.xlu1 %1896 }
 0xa36   :  { %v1902_v62 = vmul.f32 %v3031_v41, %v1897_v22  ;;  %v1945_v37 = vpop.permute.xlu2 %1944 }
 0xa37   :  { %v1950_v44 = vmul.f32 %v3103_v17, %v1945_v37 }
 0xa38   :  { %v1906_v24 = vadd.f32 %v1902_v62, %v1882_v11 }
 0xa3a   :  { %v1930_v23 = vadd.f32 %v1926_v61, %v1906_v24 }
 0xa3c   :  { %v1954_v4 = vadd.f32 %v1950_v44, %v1930_v23 }
 0xa3e   :  { %v1913_v5 = vpop.permute.xlu1 %1912 }
 0xa3f   :  { %v1924_v31 = vmul.f32 %v3095_v13, %v1913_v5 }
 0xa41   :  { %v1928_v18 = vadd.f32 %v1924_v31, %v1904_v34 }
 0xa43   :  { %v1952_v60 = vadd.f32 %v1948_v19, %v1928_v18 }
 0xa45   :  { %1961 = vrot.lane.b32.xlu1 %v1952_v60, %s2308_s11 }
 0xa47   :  { %v1933_v52 = vpop.permute.xlu1 %1932 }
 0xa48   :  { %v1947_v21 = vmul.f32 %v3103_v17, %v1933_v52 }
 0xa4a   :  { %v1951_v54 = vadd.f32 %v1947_v21, %v1927_v26 }
 0xa4c   :  { %1959 = vrot.lane.b32.xlu0 %v1951_v54, %s2308_s11 }
 0xa4f   :  { %v1941_v14 = vpop.permute.xlu1 %1940 }
 0xa50   :  { %v1949_v50 = vmul.f32 %v3103_v17, %v1941_v14 }
 0xa52   :  { %v1953_v1 = vadd.f32 %v1949_v50, %v1929_v45 }
 0xa54   :  { %1963 = vrot.lane.b32.xlu2 %v1953_v1, %s2308_s11  ;;  %1965 = vrot.lane.b32.xlu0 %v1954_v4, %s2308_s11 }
 0xaae   :  { %v1964_v41 = vpop.permute.xlu2 %1963 }
 0xaaf   :  { %1974 = vst.msk [vmem:[%s3243_s5 + $0x10] sm:$0xff] %vm1971_vm11, %v1964_v41 }
 0xab7   :  { %v1962_v12 = vpop.permute.xlu1 %1961 }
 0xab8   :  { %1973 = vst.msk [vmem:[%s3243_s5 + $0x8] sm:$0xff] %vm1971_vm11, %v1962_v12 }
 0xabe   :  { %v1960_v13 = vpop.permute.xlu0 %1959 }
 0xabf   :  { %1972 = vst.msk [vmem:[%s3243_s5] sm:$0xff] %vm1971_vm11, %v1960_v13 }
 0xac6   :  { %v1966_v17 = vpop.permute.xlu0 %1965 }
 0xac7   :  { %1975 = vst.msk [vmem:[%s3243_s5 + $0x18] sm:$0xff] %vm1971_vm11, %v1966_v17 }

</bundles_post_ra>
